<compile_context>
chip_gen: v7x
topology: tpu7x:2x2x1
jax: 0.10.0
libtpu: 0.0.40
codegen_flags: <defaults>
</compile_context>

<pallas_src>
import jax
import jax.numpy as jnp
import numpy as np
from jax import lax
from jax.experimental import pallas as pl
from jax.experimental.pallas import tpu as pltpu


def _lstm_reg_kernel(x_ref, wih_ref, whh_ref, b_ref, wreg_ref, breg_ref,
                     y_ref, xg_scr, hall_scr):
    """Single-layer LSTM (batch=1) over S steps + Linear head.

    x_ref    : (S, D)      last time-slice of seq, treated as an S-step sequence
    wih_ref  : (D, 4Hp)    W_ih^T, gate order (i, f, o, g), hidden padded to Hp
    whh_ref  : (Hp, 4Hp)   W_hh^T, same ordering / padding
    b_ref    : (1, 4Hp)    b_ih + b_hh, same ordering / padding
    wreg_ref : (Hp, O)     reg.weight^T, rows >= H are zero
    breg_ref : (1, O)      reg.bias
    y_ref    : (S, O)      output
    xg_scr   : (S, 4Hp)    hoisted input projection x @ W_ih^T + b
    hall_scr : (S, Hp)     per-step hidden states (fed to the Linear head)
    """
    S = x_ref.shape[0]
    Hp = whh_ref.shape[0]

    # Hoisted input projection + bias: independent of the recurrence, so it is
    # a single MXU op off the serial critical path.
    xg_scr[...] = (
        jnp.dot(x_ref[...], wih_ref[...], preferred_element_type=jnp.float32)
        + b_ref[...]
    )

    h0 = jnp.zeros((1, Hp), jnp.float32)
    c0 = jnp.zeros((1, Hp), jnp.float32)

    def step(t, carry):
        h, c = carry
        gates = xg_scr[pl.ds(t, 1), :] + jnp.dot(
            h, whh_ref[...], preferred_element_type=jnp.float32)  # (1, 4Hp)
        # Gate order (i, f, o, g): one sigmoid over 3*Hp contiguous lanes, one
        # tanh over the trailing Hp lanes.  All slice offsets are 128-aligned.
        sig = jax.nn.sigmoid(gates[:, 0:3 * Hp])
        g_g = jnp.tanh(gates[:, 3 * Hp:4 * Hp])
        i_g = sig[:, 0:Hp]
        f_g = sig[:, Hp:2 * Hp]
        o_g = sig[:, 2 * Hp:3 * Hp]
        c_new = f_g * c + i_g * g_g
        h_new = o_g * jnp.tanh(c_new)
        hall_scr[pl.ds(t, 1), :] = h_new
        return (h_new, c_new)

    # h / c live in vregs as loop carries; fully unrolled (S is static, small).
    lax.fori_loop(0, S, step, (h0, c0), unroll=True)

    # Linear head: one (S, Hp) @ (Hp, O) matmul + bias.
    y_ref[...] = (
        jnp.dot(hall_scr[...], wreg_ref[...], preferred_element_type=jnp.float32)
        + breg_ref[...]
    ).astype(y_ref.dtype)


def _pack_gates(w, H, Hp, axis):
    """Reorder PyTorch gate blocks (i, f, g, o) along `axis` to (i, f, o, g)
    and zero-pad each block from H to Hp."""
    i_b = lax.slice_in_dim(w, 0 * H, 1 * H, axis=axis)
    f_b = lax.slice_in_dim(w, 1 * H, 2 * H, axis=axis)
    g_b = lax.slice_in_dim(w, 2 * H, 3 * H, axis=axis)
    o_b = lax.slice_in_dim(w, 3 * H, 4 * H, axis=axis)
    pad = [(0, 0)] * w.ndim
    pad[axis] = (0, Hp - H)
    return jnp.concatenate(
        [jnp.pad(b, pad) for b in (i_b, f_b, o_b, g_b)], axis=axis)


def lstm_predict_v2(seq, params):
    """JAX/Pallas equivalent of LSTMPredictV2.forward. Returns (S, 1, O)."""
    S, T, D = seq.shape
    H = params["w_hh"].shape[1]
    O = params["w_reg"].shape[0]
    Hp = ((H + 127) // 128) * 128  # pad hidden dim to the 128-lane boundary

    # Only the last loop iteration of the PyTorch forward matters.
    x_last = seq[:, T - 1, :].astype(jnp.float32)                      # (S, D)

    w_ih_g = _pack_gates(params["w_ih"].astype(jnp.float32), H, Hp, 0)  # (4Hp, D)
    w_hh_g = _pack_gates(params["w_hh"].astype(jnp.float32), H, Hp, 0)  # (4Hp, H)
    b_g = _pack_gates(
        (params["b_ih"] + params["b_hh"]).astype(jnp.float32), H, Hp, 0)  # (4Hp,)

    w_ih_t = w_ih_g.T                                                  # (D, 4Hp)
    w_hh_t = jnp.pad(w_hh_g, ((0, 0), (0, Hp - H))).T                  # (Hp, 4Hp)
    b = b_g.reshape(1, 4 * Hp)                                         # (1, 4Hp)
    w_reg_t = jnp.pad(params["w_reg"].astype(jnp.float32).T,
                      ((0, Hp - H), (0, 0)))                           # (Hp, O)
    b_reg = params["b_reg"].reshape(1, O).astype(jnp.float32)          # (1, O)

    vmem = pl.BlockSpec(memory_space=pltpu.MemorySpace.VMEM)
    y = pl.pallas_call(
        _lstm_reg_kernel,
        out_shape=jax.ShapeDtypeStruct((S, O), jnp.float32),
        in_specs=[vmem] * 6,
        out_specs=vmem,
        scratch_shapes=[
            pltpu.VMEM((S, 4 * Hp), jnp.float32),   # hoisted input projection
            pltpu.VMEM((S, Hp), jnp.float32),       # all per-step hidden states
        ],
    )(x_last, w_ih_t, w_hh_t, b, w_reg_t, b_reg)

    return y.reshape(S, 1, O)


def reference_forward(seq, params):
    """Pure-JAX reference of the same semantics (original layout, unpadded)."""
    S, T, D = seq.shape
    H = params["w_hh"].shape[1]
    x_last = seq[:, T - 1, :].astype(jnp.float32)

    w_ih_t = params["w_ih"].T
    w_hh_t = params["w_hh"].T
    b = params["b_ih"] + params["b_hh"]

    def step(carry, x_t):
        h, c = carry
        gates = x_t @ w_ih_t + h @ w_hh_t + b
        i_g = jax.nn.sigmoid(gates[0:H])
        f_g = jax.nn.sigmoid(gates[H:2 * H])
        g_g = jnp.tanh(gates[2 * H:3 * H])
        o_g = jax.nn.sigmoid(gates[3 * H:4 * H])
        c_new = f_g * c + i_g * g_g
        h_new = o_g * jnp.tanh(c_new)
        return (h_new, c_new), h_new

    init = (jnp.zeros((H,), jnp.float32), jnp.zeros((H,), jnp.float32))
    _, hs = lax.scan(step, init, x_last)                      # (S, H)
    y = hs @ params["w_reg"].T + params["b_reg"]              # (S, O)
    return y.reshape(S, 1, -1)


def init_params(key, input_size, hidden_size, output_size):
    """Deterministic parameter init, matching nn.LSTM / nn.Linear shapes."""
    ks = jax.random.split(key, 6)
    k = 1.0 / np.sqrt(hidden_size)
    u = lambda kk, shape: jax.random.uniform(kk, shape, jnp.float32, -k, k)
    return {
        "w_ih": u(ks[0], (4 * hidden_size, input_size)),
        "w_hh": u(ks[1], (4 * hidden_size, hidden_size)),
        "b_ih": u(ks[2], (4 * hidden_size,)),
        "b_hh": u(ks[3], (4 * hidden_size,)),
        "w_reg": u(ks[4], (output_size, hidden_size)),
        "b_reg": u(ks[5], (output_size,)),
    }


if __name__ == "__main__":
    input_size, hidden_size, output_size = 8, 32, 1
    S, T = 8, 5   # seq shape (S, T, D); LSTM runs over S with batch=1

    key = jax.random.PRNGKey(0)
    k_param, k_seq = jax.random.split(key)
    params = init_params(k_param, input_size, hidden_size, output_size)
    seq = jax.random.normal(k_seq, (S, T, input_size), jnp.float32)

    out = lstm_predict_v2(seq, params)
    out = jax.block_until_ready(out)

    ref = jax.block_until_ready(reference_forward(seq, params))
    assert out.shape == (S, 1, output_size), out.shape
    np.testing.assert_allclose(np.asarray(out), np.asarray(ref),
                               rtol=1e-5, atol=1e-5)
    print("KERNEL_OK")
</pallas_src>

<mosaic_0001>
module attributes {stable_mosaic.version = 11 : i64} {
  func.func @_lstm_reg_kernel(%arg0: memref<8x8xf32, #tpu.memory_space<vmem>>, %arg1: memref<8x512xf32, #tpu.memory_space<vmem>>, %arg2: memref<128x512xf32, #tpu.memory_space<vmem>>, %arg3: memref<1x512xf32, #tpu.memory_space<vmem>>, %arg4: memref<128x1xf32, #tpu.memory_space<vmem>>, %arg5: memref<1x1xf32, #tpu.memory_space<vmem>>, %arg6: memref<8x1xf32, #tpu.memory_space<vmem>>, %arg7: memref<8x512xf32, #tpu.memory_space<vmem>>, %arg8: memref<8x128xf32, #tpu.memory_space<vmem>>) attributes {dimension_semantics = [], scalar_prefetch = 0 : i64, scratch_operands = 2 : i64, tpu.core_type = #tpu.core_type<tc>} {
    %c0 = arith.constant 0 : index
    %c0_0 = arith.constant 0 : index
    %0 = vector.load %arg0[%c0, %c0_0] : memref<8x8xf32, #tpu.memory_space<vmem>>, vector<8x8xf32>
    %c0_1 = arith.constant 0 : index
    %c0_2 = arith.constant 0 : index
    %1 = vector.load %arg1[%c0_1, %c0_2] : memref<8x512xf32, #tpu.memory_space<vmem>>, vector<8x512xf32>
    %cst = arith.constant dense<0.000000e+00> : vector<8x512xf32>
    %2 = tpu.matmul %0, %1, %cst {dimension_numbers = #tpu.dot_dimension_numbers<[1], [0], [0], [1], [0, 0, 1, 1], [], []>} : vector<8x8xf32>, vector<8x512xf32>, vector<8x512xf32> -> vector<8x512xf32>
    %c0_3 = arith.constant 0 : index
    %c0_4 = arith.constant 0 : index
    %3 = vector.load %arg3[%c0_3, %c0_4] : memref<1x512xf32, #tpu.memory_space<vmem>>, vector<1x512xf32>
    %4 = vector.broadcast %3 : vector<1x512xf32> to vector<8x512xf32>
    %5 = arith.addf %2, %4 : vector<8x512xf32>
    %c0_5 = arith.constant 0 : index
    %c0_6 = arith.constant 0 : index
    %6 = vector.load %arg7[%c0_5, %c0_6] : memref<8x512xf32, #tpu.memory_space<vmem>>, vector<8x512xf32>
    tpu.vector_store %arg7[%c0_5, %c0_6], %5 {strides = array<i32>} : memref<8x512xf32, #tpu.memory_space<vmem>>, vector<8x512xf32>,
    %cst_7 = arith.constant 0.000000e+00 : f32
    %7 = vector.broadcast %cst_7 : f32 to vector<1x128xf32>
    %cst_8 = arith.constant 0.000000e+00 : f32
    %8 = vector.broadcast %cst_8 : f32 to vector<1x128xf32>
    %c0_i32 = arith.constant 0 : i32
    %9 = arith.index_cast %c0_i32 : i32 to index
    %c0_9 = arith.constant 0 : index
    %10 = vector.load %arg7[%9, %c0_9] : memref<8x512xf32, #tpu.memory_space<vmem>>, vector<1x512xf32>
    %c0_10 = arith.constant 0 : index
    %c0_11 = arith.constant 0 : index
    %11 = vector.load %arg2[%c0_10, %c0_11] : memref<128x512xf32, #tpu.memory_space<vmem>>, vector<128x512xf32>
    %cst_12 = arith.constant dense<0.000000e+00> : vector<1x512xf32>
    %12 = tpu.matmul %7, %11, %cst_12 {dimension_numbers = #tpu.dot_dimension_numbers<[1], [0], [0], [1], [0, 0, 1, 1], [], []>} : vector<1x128xf32>, vector<128x512xf32>, vector<1x512xf32> -> vector<1x512xf32>
    %13 = arith.addf %10, %12 : vector<1x512xf32>
    %14 = vector.extract_strided_slice %13 {offsets = [0, 0], sizes = [1, 384], strides = [1, 1]} : vector<1x512xf32> to vector<1x384xf32>
    %15 = arith.negf %14 : vector<1x384xf32>
    %16 = math.exp %15 : vector<1x384xf32>
    %cst_13 = arith.constant 1.000000e+00 : f32
    %17 = vector.broadcast %cst_13 : f32 to vector<1x384xf32>
    %18 = arith.addf %17, %16 : vector<1x384xf32>
    %19 = arith.divf %17, %18 : vector<1x384xf32>
    %20 = vector.extract_strided_slice %13 {offsets = [0, 384], sizes = [1, 128], strides = [1, 1]} : vector<1x512xf32> to vector<1x128xf32>
    %21 = math.tanh %20 : vector<1x128xf32>
    %22 = vector.extract_strided_slice %19 {offsets = [0, 0], sizes = [1, 128], strides = [1, 1]} : vector<1x384xf32> to vector<1x128xf32>
    %23 = vector.extract_strided_slice %19 {offsets = [0, 128], sizes = [1, 128], strides = [1, 1]} : vector<1x384xf32> to vector<1x128xf32>
    %24 = vector.extract_strided_slice %19 {offsets = [0, 256], sizes = [1, 128], strides = [1, 1]} : vector<1x384xf32> to vector<1x128xf32>
    %25 = arith.mulf %23, %8 : vector<1x128xf32>
    %26 = arith.mulf %22, %21 : vector<1x128xf32>
    %27 = arith.addf %25, %26 : vector<1x128xf32>
    %28 = math.tanh %27 : vector<1x128xf32>
    %29 = arith.mulf %24, %28 : vector<1x128xf32>
    %30 = arith.index_cast %c0_i32 : i32 to index
    %c0_14 = arith.constant 0 : index
    %31 = vector.load %arg8[%30, %c0_14] : memref<8x128xf32, #tpu.memory_space<vmem>>, vector<1x128xf32>
    tpu.vector_store %arg8[%30, %c0_14], %29 {strides = array<i32>} : memref<8x128xf32, #tpu.memory_space<vmem>>, vector<1x128xf32>,
    %c1_i32 = arith.constant 1 : i32
    %32 = arith.index_cast %c1_i32 : i32 to index
    %c0_15 = arith.constant 0 : index
    %33 = vector.load %arg7[%32, %c0_15] : memref<8x512xf32, #tpu.memory_space<vmem>>, vector<1x512xf32>
    %c0_16 = arith.constant 0 : index
    %c0_17 = arith.constant 0 : index
    %34 = vector.load %arg2[%c0_16, %c0_17] : memref<128x512xf32, #tpu.memory_space<vmem>>, vector<128x512xf32>
    %cst_18 = arith.constant dense<0.000000e+00> : vector<1x512xf32>
    %35 = tpu.matmul %29, %34, %cst_18 {dimension_numbers = #tpu.dot_dimension_numbers<[1], [0], [0], [1], [0, 0, 1, 1], [], []>} : vector<1x128xf32>, vector<128x512xf32>, vector<1x512xf32> -> vector<1x512xf32>
    %36 = arith.addf %33, %35 : vector<1x512xf32>
    %37 = vector.extract_strided_slice %36 {offsets = [0, 0], sizes = [1, 384], strides = [1, 1]} : vector<1x512xf32> to vector<1x384xf32>
    %38 = arith.negf %37 : vector<1x384xf32>
    %39 = math.exp %38 : vector<1x384xf32>
    %cst_19 = arith.constant 1.000000e+00 : f32
    %40 = vector.broadcast %cst_19 : f32 to vector<1x384xf32>
    %41 = arith.addf %40, %39 : vector<1x384xf32>
    %42 = arith.divf %40, %41 : vector<1x384xf32>
    %43 = vector.extract_strided_slice %36 {offsets = [0, 384], sizes = [1, 128], strides = [1, 1]} : vector<1x512xf32> to vector<1x128xf32>
    %44 = math.tanh %43 : vector<1x128xf32>
    %45 = vector.extract_strided_slice %42 {offsets = [0, 0], sizes = [1, 128], strides = [1, 1]} : vector<1x384xf32> to vector<1x128xf32>
    %46 = vector.extract_strided_slice %42 {offsets = [0, 128], sizes = [1, 128], strides = [1, 1]} : vector<1x384xf32> to vector<1x128xf32>
    %47 = vector.extract_strided_slice %42 {offsets = [0, 256], sizes = [1, 128], strides = [1, 1]} : vector<1x384xf32> to vector<1x128xf32>
    %48 = arith.mulf %46, %27 : vector<1x128xf32>
    %49 = arith.mulf %45, %44 : vector<1x128xf32>
    %50 = arith.addf %48, %49 : vector<1x128xf32>
    %51 = math.tanh %50 : vector<1x128xf32>
    %52 = arith.mulf %47, %51 : vector<1x128xf32>
    %53 = arith.index_cast %c1_i32 : i32 to index
    %c0_20 = arith.constant 0 : index
    %54 = vector.load %arg8[%53, %c0_20] : memref<8x128xf32, #tpu.memory_space<vmem>>, vector<1x128xf32>
    tpu.vector_store %arg8[%53, %c0_20], %52 {strides = array<i32>} : memref<8x128xf32, #tpu.memory_space<vmem>>, vector<1x128xf32>,
    %c2_i32 = arith.constant 2 : i32
    %55 = arith.index_cast %c2_i32 : i32 to index
    %c0_21 = arith.constant 0 : index
    %56 = vector.load %arg7[%55, %c0_21] : memref<8x512xf32, #tpu.memory_space<vmem>>, vector<1x512xf32>
    %c0_22 = arith.constant 0 : index
    %c0_23 = arith.constant 0 : index
    %57 = vector.load %arg2[%c0_22, %c0_23] : memref<128x512xf32, #tpu.memory_space<vmem>>, vector<128x512xf32>
    %cst_24 = arith.constant dense<0.000000e+00> : vector<1x512xf32>
    %58 = tpu.matmul %52, %57, %cst_24 {dimension_numbers = #tpu.dot_dimension_numbers<[1], [0], [0], [1], [0, 0, 1, 1], [], []>} : vector<1x128xf32>, vector<128x512xf32>, vector<1x512xf32> -> vector<1x512xf32>
    %59 = arith.addf %56, %58 : vector<1x512xf32>
    %60 = vector.extract_strided_slice %59 {offsets = [0, 0], sizes = [1, 384], strides = [1, 1]} : vector<1x512xf32> to vector<1x384xf32>
    %61 = arith.negf %60 : vector<1x384xf32>
    %62 = math.exp %61 : vector<1x384xf32>
    %cst_25 = arith.constant 1.000000e+00 : f32
    %63 = vector.broadcast %cst_25 : f32 to vector<1x384xf32>
    %64 = arith.addf %63, %62 : vector<1x384xf32>
    %65 = arith.divf %63, %64 : vector<1x384xf32>
    %66 = vector.extract_strided_slice %59 {offsets = [0, 384], sizes = [1, 128], strides = [1, 1]} : vector<1x512xf32> to vector<1x128xf32>
    %67 = math.tanh %66 : vector<1x128xf32>
    %68 = vector.extract_strided_slice %65 {offsets = [0, 0], sizes = [1, 128], strides = [1, 1]} : vector<1x384xf32> to vector<1x128xf32>
    %69 = vector.extract_strided_slice %65 {offsets = [0, 128], sizes = [1, 128], strides = [1, 1]} : vector<1x384xf32> to vector<1x128xf32>
    %70 = vector.extract_strided_slice %65 {offsets = [0, 256], sizes = [1, 128], strides = [1, 1]} : vector<1x384xf32> to vector<1x128xf32>
    %71 = arith.mulf %69, %50 : vector<1x128xf32>
    %72 = arith.mulf %68, %67 : vector<1x128xf32>
    %73 = arith.addf %71, %72 : vector<1x128xf32>
    %74 = math.tanh %73 : vector<1x128xf32>
    %75 = arith.mulf %70, %74 : vector<1x128xf32>
    %76 = arith.index_cast %c2_i32 : i32 to index
    %c0_26 = arith.constant 0 : index
    %77 = vector.load %arg8[%76, %c0_26] : memref<8x128xf32, #tpu.memory_space<vmem>>, vector<1x128xf32>
    tpu.vector_store %arg8[%76, %c0_26], %75 {strides = array<i32>} : memref<8x128xf32, #tpu.memory_space<vmem>>, vector<1x128xf32>,
    %c3_i32 = arith.constant 3 : i32
    %78 = arith.index_cast %c3_i32 : i32 to index
    %c0_27 = arith.constant 0 : index
    %79 = vector.load %arg7[%78, %c0_27] : memref<8x512xf32, #tpu.memory_space<vmem>>, vector<1x512xf32>
    %c0_28 = arith.constant 0 : index
    %c0_29 = arith.constant 0 : index
    %80 = vector.load %arg2[%c0_28, %c0_29] : memref<128x512xf32, #tpu.memory_space<vmem>>, vector<128x512xf32>
    %cst_30 = arith.constant dense<0.000000e+00> : vector<1x512xf32>
    %81 = tpu.matmul %75, %80, %cst_30 {dimension_numbers = #tpu.dot_dimension_numbers<[1], [0], [0], [1], [0, 0, 1, 1], [], []>} : vector<1x128xf32>, vector<128x512xf32>, vector<1x512xf32> -> vector<1x512xf32>
    %82 = arith.addf %79, %81 : vector<1x512xf32>
    %83 = vector.extract_strided_slice %82 {offsets = [0, 0], sizes = [1, 384], strides = [1, 1]} : vector<1x512xf32> to vector<1x384xf32>
    %84 = arith.negf %83 : vector<1x384xf32>
    %85 = math.exp %84 : vector<1x384xf32>
    %cst_31 = arith.constant 1.000000e+00 : f32
    %86 = vector.broadcast %cst_31 : f32 to vector<1x384xf32>
    %87 = arith.addf %86, %85 : vector<1x384xf32>
    %88 = arith.divf %86, %87 : vector<1x384xf32>
    %89 = vector.extract_strided_slice %82 {offsets = [0, 384], sizes = [1, 128], strides = [1, 1]} : vector<1x512xf32> to vector<1x128xf32>
    %90 = math.tanh %89 : vector<1x128xf32>
    %91 = vector.extract_strided_slice %88 {offsets = [0, 0], sizes = [1, 128], strides = [1, 1]} : vector<1x384xf32> to vector<1x128xf32>
    %92 = vector.extract_strided_slice %88 {offsets = [0, 128], sizes = [1, 128], strides = [1, 1]} : vector<1x384xf32> to vector<1x128xf32>
    %93 = vector.extract_strided_slice %88 {offsets = [0, 256], sizes = [1, 128], strides = [1, 1]} : vector<1x384xf32> to vector<1x128xf32>
    %94 = arith.mulf %92, %73 : vector<1x128xf32>
    %95 = arith.mulf %91, %90 : vector<1x128xf32>
    %96 = arith.addf %94, %95 : vector<1x128xf32>
    %97 = math.tanh %96 : vector<1x128xf32>
    %98 = arith.mulf %93, %97 : vector<1x128xf32>
    %99 = arith.index_cast %c3_i32 : i32 to index
    %c0_32 = arith.constant 0 : index
    %100 = vector.load %arg8[%99, %c0_32] : memref<8x128xf32, #tpu.memory_space<vmem>>, vector<1x128xf32>
    tpu.vector_store %arg8[%99, %c0_32], %98 {strides = array<i32>} : memref<8x128xf32, #tpu.memory_space<vmem>>, vector<1x128xf32>,
    %c4_i32 = arith.constant 4 : i32
    %101 = arith.index_cast %c4_i32 : i32 to index
    %c0_33 = arith.constant 0 : index
    %102 = vector.load %arg7[%101, %c0_33] : memref<8x512xf32, #tpu.memory_space<vmem>>, vector<1x512xf32>
    %c0_34 = arith.constant 0 : index
    %c0_35 = arith.constant 0 : index
    %103 = vector.load %arg2[%c0_34, %c0_35] : memref<128x512xf32, #tpu.memory_space<vmem>>, vector<128x512xf32>
    %cst_36 = arith.constant dense<0.000000e+00> : vector<1x512xf32>
    %104 = tpu.matmul %98, %103, %cst_36 {dimension_numbers = #tpu.dot_dimension_numbers<[1], [0], [0], [1], [0, 0, 1, 1], [], []>} : vector<1x128xf32>, vector<128x512xf32>, vector<1x512xf32> -> vector<1x512xf32>
    %105 = arith.addf %102, %104 : vector<1x512xf32>
    %106 = vector.extract_strided_slice %105 {offsets = [0, 0], sizes = [1, 384], strides = [1, 1]} : vector<1x512xf32> to vector<1x384xf32>
    %107 = arith.negf %106 : vector<1x384xf32>
    %108 = math.exp %107 : vector<1x384xf32>
    %cst_37 = arith.constant 1.000000e+00 : f32
    %109 = vector.broadcast %cst_37 : f32 to vector<1x384xf32>
    %110 = arith.addf %109, %108 : vector<1x384xf32>
    %111 = arith.divf %109, %110 : vector<1x384xf32>
    %112 = vector.extract_strided_slice %105 {offsets = [0, 384], sizes = [1, 128], strides = [1, 1]} : vector<1x512xf32> to vector<1x128xf32>
    %113 = math.tanh %112 : vector<1x128xf32>
    %114 = vector.extract_strided_slice %111 {offsets = [0, 0], sizes = [1, 128], strides = [1, 1]} : vector<1x384xf32> to vector<1x128xf32>
    %115 = vector.extract_strided_slice %111 {offsets = [0, 128], sizes = [1, 128], strides = [1, 1]} : vector<1x384xf32> to vector<1x128xf32>
    %116 = vector.extract_strided_slice %111 {offsets = [0, 256], sizes = [1, 128], strides = [1, 1]} : vector<1x384xf32> to vector<1x128xf32>
    %117 = arith.mulf %115, %96 : vector<1x128xf32>
    %118 = arith.mulf %114, %113 : vector<1x128xf32>
    %119 = arith.addf %117, %118 : vector<1x128xf32>
    %120 = math.tanh %119 : vector<1x128xf32>
    %121 = arith.mulf %116, %120 : vector<1x128xf32>
    %122 = arith.index_cast %c4_i32 : i32 to index
    %c0_38 = arith.constant 0 : index
    %123 = vector.load %arg8[%122, %c0_38] : memref<8x128xf32, #tpu.memory_space<vmem>>, vector<1x128xf32>
    tpu.vector_store %arg8[%122, %c0_38], %121 {strides = array<i32>} : memref<8x128xf32, #tpu.memory_space<vmem>>, vector<1x128xf32>,
    %c5_i32 = arith.constant 5 : i32
    %124 = arith.index_cast %c5_i32 : i32 to index
    %c0_39 = arith.constant 0 : index
    %125 = vector.load %arg7[%124, %c0_39] : memref<8x512xf32, #tpu.memory_space<vmem>>, vector<1x512xf32>
    %c0_40 = arith.constant 0 : index
    %c0_41 = arith.constant 0 : index
    %126 = vector.load %arg2[%c0_40, %c0_41] : memref<128x512xf32, #tpu.memory_space<vmem>>, vector<128x512xf32>
    %cst_42 = arith.constant dense<0.000000e+00> : vector<1x512xf32>
    %127 = tpu.matmul %121, %126, %cst_42 {dimension_numbers = #tpu.dot_dimension_numbers<[1], [0], [0], [1], [0, 0, 1, 1], [], []>} : vector<1x128xf32>, vector<128x512xf32>, vector<1x512xf32> -> vector<1x512xf32>
    %128 = arith.addf %125, %127 : vector<1x512xf32>
    %129 = vector.extract_strided_slice %128 {offsets = [0, 0], sizes = [1, 384], strides = [1, 1]} : vector<1x512xf32> to vector<1x384xf32>
    %130 = arith.negf %129 : vector<1x384xf32>
    %131 = math.exp %130 : vector<1x384xf32>
    %cst_43 = arith.constant 1.000000e+00 : f32
    %132 = vector.broadcast %cst_43 : f32 to vector<1x384xf32>
    %133 = arith.addf %132, %131 : vector<1x384xf32>
    %134 = arith.divf %132, %133 : vector<1x384xf32>
    %135 = vector.extract_strided_slice %128 {offsets = [0, 384], sizes = [1, 128], strides = [1, 1]} : vector<1x512xf32> to vector<1x128xf32>
    %136 = math.tanh %135 : vector<1x128xf32>
    %137 = vector.extract_strided_slice %134 {offsets = [0, 0], sizes = [1, 128], strides = [1, 1]} : vector<1x384xf32> to vector<1x128xf32>
    %138 = vector.extract_strided_slice %134 {offsets = [0, 128], sizes = [1, 128], strides = [1, 1]} : vector<1x384xf32> to vector<1x128xf32>
    %139 = vector.extract_strided_slice %134 {offsets = [0, 256], sizes = [1, 128], strides = [1, 1]} : vector<1x384xf32> to vector<1x128xf32>
    %140 = arith.mulf %138, %119 : vector<1x128xf32>
    %141 = arith.mulf %137, %136 : vector<1x128xf32>
    %142 = arith.addf %140, %141 : vector<1x128xf32>
    %143 = math.tanh %142 : vector<1x128xf32>
    %144 = arith.mulf %139, %143 : vector<1x128xf32>
    %145 = arith.index_cast %c5_i32 : i32 to index
    %c0_44 = arith.constant 0 : index
    %146 = vector.load %arg8[%145, %c0_44] : memref<8x128xf32, #tpu.memory_space<vmem>>, vector<1x128xf32>
    tpu.vector_store %arg8[%145, %c0_44], %144 {strides = array<i32>} : memref<8x128xf32, #tpu.memory_space<vmem>>, vector<1x128xf32>,
    %c6_i32 = arith.constant 6 : i32
    %147 = arith.index_cast %c6_i32 : i32 to index
    %c0_45 = arith.constant 0 : index
    %148 = vector.load %arg7[%147, %c0_45] : memref<8x512xf32, #tpu.memory_space<vmem>>, vector<1x512xf32>
    %c0_46 = arith.constant 0 : index
    %c0_47 = arith.constant 0 : index
    %149 = vector.load %arg2[%c0_46, %c0_47] : memref<128x512xf32, #tpu.memory_space<vmem>>, vector<128x512xf32>
    %cst_48 = arith.constant dense<0.000000e+00> : vector<1x512xf32>
    %150 = tpu.matmul %144, %149, %cst_48 {dimension_numbers = #tpu.dot_dimension_numbers<[1], [0], [0], [1], [0, 0, 1, 1], [], []>} : vector<1x128xf32>, vector<128x512xf32>, vector<1x512xf32> -> vector<1x512xf32>
    %151 = arith.addf %148, %150 : vector<1x512xf32>
    %152 = vector.extract_strided_slice %151 {offsets = [0, 0], sizes = [1, 384], strides = [1, 1]} : vector<1x512xf32> to vector<1x384xf32>
    %153 = arith.negf %152 : vector<1x384xf32>
    %154 = math.exp %153 : vector<1x384xf32>
    %cst_49 = arith.constant 1.000000e+00 : f32
    %155 = vector.broadcast %cst_49 : f32 to vector<1x384xf32>
    %156 = arith.addf %155, %154 : vector<1x384xf32>
    %157 = arith.divf %155, %156 : vector<1x384xf32>
    %158 = vector.extract_strided_slice %151 {offsets = [0, 384], sizes = [1, 128], strides = [1, 1]} : vector<1x512xf32> to vector<1x128xf32>
    %159 = math.tanh %158 : vector<1x128xf32>
    %160 = vector.extract_strided_slice %157 {offsets = [0, 0], sizes = [1, 128], strides = [1, 1]} : vector<1x384xf32> to vector<1x128xf32>
    %161 = vector.extract_strided_slice %157 {offsets = [0, 128], sizes = [1, 128], strides = [1, 1]} : vector<1x384xf32> to vector<1x128xf32>
    %162 = vector.extract_strided_slice %157 {offsets = [0, 256], sizes = [1, 128], strides = [1, 1]} : vector<1x384xf32> to vector<1x128xf32>
    %163 = arith.mulf %161, %142 : vector<1x128xf32>
    %164 = arith.mulf %160, %159 : vector<1x128xf32>
    %165 = arith.addf %163, %164 : vector<1x128xf32>
    %166 = math.tanh %165 : vector<1x128xf32>
    %167 = arith.mulf %162, %166 : vector<1x128xf32>
    %168 = arith.index_cast %c6_i32 : i32 to index
    %c0_50 = arith.constant 0 : index
    %169 = vector.load %arg8[%168, %c0_50] : memref<8x128xf32, #tpu.memory_space<vmem>>, vector<1x128xf32>
    tpu.vector_store %arg8[%168, %c0_50], %167 {strides = array<i32>} : memref<8x128xf32, #tpu.memory_space<vmem>>, vector<1x128xf32>,
    %c7_i32 = arith.constant 7 : i32
    %170 = arith.index_cast %c7_i32 : i32 to index
    %c0_51 = arith.constant 0 : index
    %171 = vector.load %arg7[%170, %c0_51] : memref<8x512xf32, #tpu.memory_space<vmem>>, vector<1x512xf32>
    %c0_52 = arith.constant 0 : index
    %c0_53 = arith.constant 0 : index
    %172 = vector.load %arg2[%c0_52, %c0_53] : memref<128x512xf32, #tpu.memory_space<vmem>>, vector<128x512xf32>
    %cst_54 = arith.constant dense<0.000000e+00> : vector<1x512xf32>
    %173 = tpu.matmul %167, %172, %cst_54 {dimension_numbers = #tpu.dot_dimension_numbers<[1], [0], [0], [1], [0, 0, 1, 1], [], []>} : vector<1x128xf32>, vector<128x512xf32>, vector<1x512xf32> -> vector<1x512xf32>
    %174 = arith.addf %171, %173 : vector<1x512xf32>
    %175 = vector.extract_strided_slice %174 {offsets = [0, 0], sizes = [1, 384], strides = [1, 1]} : vector<1x512xf32> to vector<1x384xf32>
    %176 = arith.negf %175 : vector<1x384xf32>
    %177 = math.exp %176 : vector<1x384xf32>
    %cst_55 = arith.constant 1.000000e+00 : f32
    %178 = vector.broadcast %cst_55 : f32 to vector<1x384xf32>
    %179 = arith.addf %178, %177 : vector<1x384xf32>
    %180 = arith.divf %178, %179 : vector<1x384xf32>
    %181 = vector.extract_strided_slice %174 {offsets = [0, 384], sizes = [1, 128], strides = [1, 1]} : vector<1x512xf32> to vector<1x128xf32>
    %182 = math.tanh %181 : vector<1x128xf32>
    %183 = vector.extract_strided_slice %180 {offsets = [0, 0], sizes = [1, 128], strides = [1, 1]} : vector<1x384xf32> to vector<1x128xf32>
    %184 = vector.extract_strided_slice %180 {offsets = [0, 128], sizes = [1, 128], strides = [1, 1]} : vector<1x384xf32> to vector<1x128xf32>
    %185 = vector.extract_strided_slice %180 {offsets = [0, 256], sizes = [1, 128], strides = [1, 1]} : vector<1x384xf32> to vector<1x128xf32>
    %186 = arith.mulf %184, %165 : vector<1x128xf32>
    %187 = arith.mulf %183, %182 : vector<1x128xf32>
    %188 = arith.addf %186, %187 : vector<1x128xf32>
    %189 = math.tanh %188 : vector<1x128xf32>
    %190 = arith.mulf %185, %189 : vector<1x128xf32>
    %191 = arith.index_cast %c7_i32 : i32 to index
    %c0_56 = arith.constant 0 : index
    %192 = vector.load %arg8[%191, %c0_56] : memref<8x128xf32, #tpu.memory_space<vmem>>, vector<1x128xf32>
    tpu.vector_store %arg8[%191, %c0_56], %190 {strides = array<i32>} : memref<8x128xf32, #tpu.memory_space<vmem>>, vector<1x128xf32>,
    %c8_i32 = arith.constant 8 : i32
    %c0_57 = arith.constant 0 : index
    %c0_58 = arith.constant 0 : index
    %193 = vector.load %arg8[%c0_57, %c0_58] : memref<8x128xf32, #tpu.memory_space<vmem>>, vector<8x128xf32>
    %c0_59 = arith.constant 0 : index
    %c0_60 = arith.constant 0 : index
    %194 = vector.load %arg4[%c0_59, %c0_60] : memref<128x1xf32, #tpu.memory_space<vmem>>, vector<128x1xf32>
    %cst_61 = arith.constant dense<0.000000e+00> : vector<8x1xf32>
    %195 = tpu.matmul %193, %194, %cst_61 {dimension_numbers = #tpu.dot_dimension_numbers<[1], [0], [0], [1], [0, 0, 1, 1], [], []>} : vector<8x128xf32>, vector<128x1xf32>, vector<8x1xf32> -> vector<8x1xf32>
    %c0_62 = arith.constant 0 : index
    %c0_63 = arith.constant 0 : index
    %196 = vector.load %arg5[%c0_62, %c0_63] : memref<1x1xf32, #tpu.memory_space<vmem>>, vector<1x1xf32>
    %197 = vector.broadcast %196 : vector<1x1xf32> to vector<8x1xf32>
    %198 = arith.addf %195, %197 : vector<8x1xf32>
    %c0_64 = arith.constant 0 : index
    %c0_65 = arith.constant 0 : index
    %199 = vector.load %arg6[%c0_64, %c0_65] : memref<8x1xf32, #tpu.memory_space<vmem>>, vector<8x1xf32>
    tpu.vector_store %arg6[%c0_64, %c0_65], %198 {strides = array<i32>} : memref<8x1xf32, #tpu.memory_space<vmem>>, vector<8x1xf32>,
    return
  }
}

</mosaic_0001>

<bundles_post_ra>
// kernel: tpu_custom_call.1
= control target key start
LH: loop header
LB: loop body
LE: loop exit
PB: predicated region body
PF: predicated region fallthrough
CT: control target
= control target key end

     0   :  { %s3669_s0 = inlined_call_operand.vmem [shape: f32[8,8], index: 0, kind: input, shape index: {}]   ;;  %s3670_s1 = inlined_call_operand.vmem [shape: f32[8,512], index: 1, kind: input, shape index: {}]   ;;  %s3671_s2 = inlined_call_operand.hbm [shape: f32[128,512], index: 2, kind: input, shape index: {}]   ;;  %s3672_s3 = inlined_call_operand.vmem [shape: f32[1,512], index: 3, kind: input, shape index: {}]   ;;  %s3673_s4 = inlined_call_operand.vmem [shape: f32[128,1], index: 4, kind: input, shape index: {}]   ;;  %s3674_s5 = inlined_call_operand.<no memory space> [shape: f32[1,1], index: 5, kind: input, shape index: {}]   ;;  %s3675_s6 = inlined_call_operand.vmem [shape: f32[8,1], index: 6, kind: output, shape index: {}]  }
   0x1   :  { %v11_v0 = vstv %s3674_s5 }
   0x2   :  { %12 = vst [vmem:[#allocation4] sm:$0x1] %v11_v0 }
   0x3   :  { %13 = vsyncpa [#allocation6], 0  ;;  %s3082_s23 = smov [#allocation5]   ;;  %s3058_s27 = scalar_lea.hbm %s3671_s2, 8192 }
   0x4   :  { %s23_s24 = sshll.u32 %s3082_s23, 4  ;;  %p3059_p0 = scmp.ne.s32.totalorder %s3671_s2, %s3058_s27  ;;  %s24_s24 = int_to_ptr.vmem [resolvable:$true] %s23_s24 }
   0x5   :  { %p3062_p1 = scmp.lt.u32.totalorder %s3058_s27, %s3671_s2 }
   0x7   :  { %p3064_p2 = pnand %p3062_p1, %p3059_p0 }
   0x9   :  { %3067 = shalt.err (!%p3064_p2)
}
   0xa   :  { %s3068_s5 = scalar_lea.vmem %s24_s24, 8192  ;;  %p3073_p4 = scmp.lt.s32.totalorder %s24_s24, %s24_s24 }
   0xb   :  { %p3069_p3 = scmp.ne.s32.totalorder %s24_s24, %s3068_s5  ;;  %p3074_p5 = scmp.lt.s32.totalorder %s3068_s5, %s3068_s5 }
   0xd   :  { %p3075_p6 = por %p3074_p5, %p3073_p4 }
   0xf   :  { %p3076_p7 = pnand %p3075_p6, %p3069_p3 }
  0x11   :  { %3079 = shalt.err (!%p3076_p7)
}
  0x12   :  { %s3083_s8 = smov 512   ;;  %s3084_s9 = smov 32  }
  0x13   :  { %29 = dma.hbm_to_vmem [thread:$0]  %s3671_s2, 8192, %s24_s24, [#allocation6], %s3083_s8, %s3083_s8, %s3084_s9  }
  0x14   :  { %3080 = dma.done.wait [#allocation6], 8192  }
  0x15   :  { %3081 = vsyncadd [#allocation6], 4294959104  ;;  %v3085_v1 = vmov 0.0   ;;  %v41_v2 = vld [vmem:[%s3670_s1 + $0x8] sm:$0xff]  ;;  %v40_v3 = vld [vmem:[%s3670_s1] sm:$0xff]  ;;  %vm66_vm0 = vcmask 64512  }
  0x16   :  { %134 = vmatprep.mubr.f32.mxu1 %v3085_v1  ;;  %345 = vmatprep.mubr.f32.mxu0 %v3085_v1  ;;  %v39_v4 = vld [vmem:[%s3669_s0] sm:$0xff]  ;;  %v43_v5 = vld [vmem:[%s3670_s1 + $0x18] sm:$0xff]  ;;  %v42_v6 = vld [vmem:[%s3670_s1 + $0x10] sm:$0xff]  ;;  %vm3088_vm1 = vmmov 0   ;;  %vm2381_vm2 = vcmask 7168  }
  0x17   :  { %70 = vmatprep.subr.mxu1 %v41_v2  ;;  %v218_v7 = vld [vmem:[#allocation5 + $0x8] sm:$0xff]  ;;  %v220_v9 = vld [vmem:[#allocation5 + $0x18] sm:$0xff]  ;;  %v217_v13 = vld [vmem:[#allocation5] sm:$0xff] }
  0x18   :  { %71 = vmatpush1.msra.mxu1 %v40_v3  ;;  %v222_v8 = vld [vmem:[#allocation5 + $0x28] sm:$0xff]  ;;  %v224_v10 = vld [vmem:[#allocation5 + $0x38] sm:$0xff]  ;;  %v221_v14 = vld [vmem:[#allocation5 + $0x20] sm:$0xff] }
  0x19   :  { %2388 = vmatmul.mubr.msk.f32.vlgmr.msra.gmra.mrb[0].mxu1 %vm66_vm0, %v39_v4  ;;  %141 = vmatprep.subr.mxu1 %v43_v5  ;;  %v3157_v11 = vpack.c.bf16 %v222_v8, %v218_v7  ;;  %v3159_v12 = vpack.c.bf16 %v224_v10, %v220_v9  ;;  %v219_v15 = vld [vmem:[#allocation5 + $0x10] sm:$0xff]  ;;  %v3162_v16 = vpack.c.bf16 %v221_v14, %v217_v13  ;;  %v226_v18 = vld [vmem:[#allocation5 + $0x48] sm:$0xff]  ;;  %v228_v22 = vld [vmem:[#allocation5 + $0x58] sm:$0xff] }
  0x1a   :  { %142 = vmatpush1.msra.mxu1 %v42_v6  ;;  %205 = vmatprep.mubr.f32.mxu1 %v3085_v1  ;;  %v223_v17 = vld [vmem:[#allocation5 + $0x30] sm:$0xff]  ;;  %v230_v19 = vld [vmem:[#allocation5 + $0x68] sm:$0xff]  ;;  %v232_v23 = vld [vmem:[#allocation5 + $0x78] sm:$0xff] }
  0x1b   :  { %2452 = vmatprep.subr.bf16.mxu0 %v3157_v11  ;;  %2484 = vmatprep.subr.bf16.mxu1 %v3159_v12  ;;  %v3166_v20 = vpack.c.bf16 %v223_v17, %v219_v15  ;;  %v3168_v21 = vpack.c.bf16 %v230_v19, %v226_v18  ;;  %v225_v24 = vld [vmem:[#allocation5 + $0x40] sm:$0xff]  ;;  %v3171_v25 = vpack.c.bf16 %v232_v23, %v228_v22  ;;  %v227_v27 = vld [vmem:[#allocation5 + $0x50] sm:$0xff]  ;;  %v234_v30 = vld [vmem:[#allocation5 + $0x88] sm:$0xff] }
  0x1c   :  { %2454 = vmatpush1.bf16.msra.mxu0 %v3162_v16  ;;  %v229_v26 = vld [vmem:[#allocation5 + $0x60] sm:$0xff]  ;;  %v231_v28 = vld [vmem:[#allocation5 + $0x70] sm:$0xff]  ;;  %v238_v31 = vld [vmem:[#allocation5 + $0xa8] sm:$0xff] }
  0x1d   :  { %2389 = vmatmul.mubr.msk.f32.vlgmr.msra.gmra.mrb[2].mxu1 %vm66_vm0, %v39_v4  ;;  %2456 = vmatprep.subr.bf16.mxu0 %v3168_v21  ;;  %v3175_v29 = vpack.c.bf16 %v229_v26, %v225_v24  ;;  %v236_v32 = vld [vmem:[#allocation5 + $0x98] sm:$0xff]  ;;  %v3178_v33 = vpack.c.bf16 %v231_v28, %v227_v27  ;;  %v3180_v34 = vpack.c.bf16 %v238_v31, %v234_v30  ;;  %v233_v36 = vld [vmem:[#allocation5 + $0x80] sm:$0xff]  ;;  %v235_v39 = vld [vmem:[#allocation5 + $0x90] sm:$0xff] }
  0x1e   :  { %2486 = vmatpush1.bf16.msra.mxu1 %v3166_v20  ;;  %v240_v35 = vld [vmem:[#allocation5 + $0xb8] sm:$0xff]  ;;  %v237_v37 = vld [vmem:[#allocation5 + $0xa0] sm:$0xff]  ;;  %416 = vmatprep.mubr.f32.mxu1 %v3085_v1  ;;  %v239_v40 = vld [vmem:[#allocation5 + $0xb0] sm:$0xff] }
  0x1f   :  { %2488 = vmatprep.subr.bf16.mxu1 %v3171_v25  ;;  %v3184_v38 = vpack.c.bf16 %v240_v35, %v236_v32  ;;  %v242_v41 = vld [vmem:[#allocation5 + $0xc8] sm:$0xff]  ;;  %v3187_v42 = vpack.c.bf16 %v237_v37, %v233_v36  ;;  %v244_v44 = vld [vmem:[#allocation5 + $0xd8] sm:$0xff]  ;;  %v241_v47 = vld [vmem:[#allocation5 + $0xc0] sm:$0xff]  ;;  %v3193_v49 = vpack.c.bf16 %v239_v40, %v235_v39 }
  0x20   :  { %2458 = vmatpush1.bf16.msra.mxu0 %v3175_v29  ;;  %v246_v43 = vld [vmem:[#allocation5 + $0xe8] sm:$0xff]  ;;  %v248_v45 = vld [vmem:[#allocation5 + $0xf8] sm:$0xff]  ;;  %v245_v48 = vld [vmem:[#allocation5 + $0xe0] sm:$0xff] }
  0x21   :  { %2460 = vmatprep.subr.bf16.mxu0 %v3180_v34  ;;  %v3190_v46 = vpack.c.bf16 %v246_v43, %v242_v41  ;;  %v250_v50 = vld [vmem:[#allocation5 + $0x108] sm:$0xff]  ;;  %v3196_v52 = vpack.c.bf16 %v248_v45, %v244_v44  ;;  %v243_v53 = vld [vmem:[#allocation5 + $0xd0] sm:$0xff]  ;;  %v3199_v55 = vpack.c.bf16 %v245_v48, %v241_v47  ;;  %v252_v56 = vld [vmem:[#allocation5 + $0x118] sm:$0xff] }
  0x22   :  { %2490 = vmatpush1.bf16.msra.mxu1 %v3178_v33  ;;  %v254_v51 = vld [vmem:[#allocation5 + $0x128] sm:$0xff]  ;;  %v247_v54 = vld [vmem:[#allocation5 + $0xf0] sm:$0xff]  ;;  %v256_v57 = vld [vmem:[#allocation5 + $0x138] sm:$0xff] }
  0x23   :  { %2492 = vmatprep.subr.bf16.mxu1 %v3184_v38  ;;  %v3202_v58 = vpack.c.bf16 %v254_v51, %v250_v50  ;;  %v249_v59 = vld [vmem:[#allocation5 + $0x100] sm:$0xff]  ;;  %v3205_v61 = vpack.c.bf16 %v247_v54, %v243_v53  ;;  %v258_v62 = vld [vmem:[#allocation5 + $0x148] sm:$0xff]  ;;  %v3208_v0 = vpack.c.bf16 %v256_v57, %v252_v56  ;;  %v251_v2 = vld [vmem:[#allocation5 + $0x110] sm:$0xff]  ;;  %v46_v54 = vlaneseq }
  0x24   :  { %2462 = vmatpush1.bf16.msra.mxu0 %v3187_v42  ;;  %v253_v60 = vld [vmem:[#allocation5 + $0x120] sm:$0xff]  ;;  %v262_v63 = vld [vmem:[#allocation5 + $0x168] sm:$0xff]  ;;  %v255_v3 = vld [vmem:[#allocation5 + $0x130] sm:$0xff] }
  0x25   :  { %2464 = vmatprep.subr.bf16.mxu0 %v3190_v46  ;;  %v3211_v4 = vpack.c.bf16 %v253_v60, %v249_v59  ;;  %v260_v5 = vld [vmem:[#allocation5 + $0x158] sm:$0xff]  ;;  %v3214_v7 = vpack.c.bf16 %v262_v63, %v258_v62  ;;  %v257_v8 = vld [vmem:[#allocation5 + $0x140] sm:$0xff]  ;;  %v3217_v10 = vpack.c.bf16 %v255_v3, %v251_v2  ;;  %v266_v13 = vld [vmem:[#allocation5 + $0x188] sm:$0xff]  ;;  %v47_v56 = vshrl.u32 %v46_v54, 7 }
  0x26   :  { %2494 = vmatpush1.bf16.msra.mxu1 %v3193_v49  ;;  %v264_v6 = vld [vmem:[#allocation5 + $0x178] sm:$0xff]  ;;  %v261_v9 = vld [vmem:[#allocation5 + $0x160] sm:$0xff]  ;;  %v270_v14 = vld [vmem:[#allocation5 + $0x1a8] sm:$0xff] }
  0x27   :  { %2496 = vmatprep.subr.bf16.mxu1 %v3196_v52  ;;  %v3220_v15 = vpack.c.bf16 %v264_v6, %v260_v5  ;;  %v259_v17 = vld [vmem:[#allocation5 + $0x150] sm:$0xff]  ;;  %v3223_v19 = vpack.c.bf16 %v261_v9, %v257_v8  ;;  %v268_v22 = vld [vmem:[#allocation5 + $0x198] sm:$0xff]  ;;  %v3226_v24 = vpack.c.bf16 %v270_v14, %v266_v13  ;;  %v265_v26 = vld [vmem:[#allocation5 + $0x180] sm:$0xff]  ;;  %v48_v57 = vsub.s32 0, %v47_v56 }
  0x28   :  { %2466 = vmatpush1.bf16.msra.mxu0 %v3199_v55  ;;  %v263_v18 = vld [vmem:[#allocation5 + $0x170] sm:$0xff]  ;;  %v272_v23 = vld [vmem:[#allocation5 + $0x1b8] sm:$0xff]  ;;  %v269_v27 = vld [vmem:[#allocation5 + $0x1a0] sm:$0xff]  ;;  %v52_v60 = vsub.s32 1, %v47_v56  ;;  %v56_v63 = vsub.s32 2, %v47_v56  ;;  %v60_v3 = vsub.s32 3, %v47_v56 }
  0x29   :  { %2468 = vmatprep.subr.bf16.mxu0 %v3202_v58  ;;  %v3229_v28 = vpack.c.bf16 %v263_v18, %v259_v17  ;;  %v274_v30 = vld [vmem:[#allocation5 + $0x1c8] sm:$0xff]  ;;  %v3232_v32 = vpack.c.bf16 %v272_v23, %v268_v22  ;;  %v267_v35 = vld [vmem:[#allocation5 + $0x190] sm:$0xff]  ;;  %v3235_v37 = vpack.c.bf16 %v269_v27, %v265_v26  ;;  %v276_v39 = vld [vmem:[#allocation5 + $0x1d8] sm:$0xff]  ;;  %v3086_v26 = vmov 1966171168  }
  0x2a   :  { %2498 = vmatpush1.bf16.msra.mxu1 %v3205_v61  ;;  %v278_v31 = vld [vmem:[#allocation5 + $0x1e8] sm:$0xff]  ;;  %v271_v36 = vld [vmem:[#allocation5 + $0x1b0] sm:$0xff]  ;;  %v280_v40 = vld [vmem:[#allocation5 + $0x1f8] sm:$0xff]  ;;  %v430_v27 = vunpack.c.l.s4 %v3086_v26 }
  0x2b   :  { %2500 = vmatprep.subr.bf16.mxu1 %v3208_v0  ;;  %v3238_v41 = vpack.c.bf16 %v278_v31, %v274_v30  ;;  %v273_v43 = vld [vmem:[#allocation5 + $0x1c0] sm:$0xff]  ;;  %v3241_v45 = vpack.c.bf16 %v271_v36, %v267_v35  ;;  %v3244_v47 = vpack.c.bf16 %v280_v40, %v276_v39  ;;  %v275_v48 = vld [vmem:[#allocation5 + $0x1d0] sm:$0xff] }
  0x2c   :  { %2470 = vmatpush1.bf16.msra.mxu0 %v3211_v4  ;;  %v277_v44 = vld [vmem:[#allocation5 + $0x1e0] sm:$0xff]  ;;  %v279_v50 = vld [vmem:[#allocation5 + $0x1f0] sm:$0xff]  ;;  %v431_v30 = vunpack.c.0.s8 %v430_v27 }
  0x2d   :  { %2472 = vmatprep.subr.bf16.mxu0 %v3214_v7  ;;  %v3247_v51 = vpack.c.bf16 %v277_v44, %v273_v43  ;;  %v3251_v53 = vpack.c.bf16 %v279_v50, %v275_v48  ;;  %v44_v59 = vld [vmem:[%s3672_s3] sm:$0xf] }
  0x2e   :  { %2502 = vmatpush1.bf16.msra.mxu1 %v3217_v10  ;;  %v49_v62 = vrot.slane %v44_v59, %v48_v57  ;;  %v53_v2 = vrot.slane %v44_v59, %v52_v60  ;;  %v57_v9 = vrot.slane %v44_v59, %v56_v63  ;;  %v61_v14 = vrot.slane %v44_v59, %v60_v3 }
  0x2f   :  { %2504 = vmatprep.subr.bf16.mxu1 %v3220_v15  ;;  %v3297_v31 = vsub.s32 %v431_v30, %v47_v56 }
  0x30   :  { %2474 = vmatpush1.bf16.msra.mxu0 %v3223_v19 }
  0x31   :  { %2476 = vmatprep.subr.bf16.mxu0 %v3226_v24 }
  0x32   :  { %2506 = vmatpush1.bf16.msra.mxu1 %v3229_v28 }
  0x33   :  { %2508 = vmatprep.subr.bf16.mxu1 %v3232_v32 }
  0x34   :  { %2478 = vmatpush1.bf16.msra.mxu0 %v3235_v37 }
  0x35   :  { %2480 = vmatprep.subr.bf16.mxu0 %v3238_v41 }
  0x36   :  { %2510 = vmatpush1.bf16.msra.mxu1 %v3241_v45 }
  0x37   :  { %2512 = vmatprep.subr.bf16.mxu1 %v3244_v47 }
  0x38   :  { %2482 = vmatpush1.bf16.msra.mxu0 %v3247_v51 }
  0x39   :  { %2516 = vmatprep.subr.bf16.mxu0 %v3157_v11 }
  0x3a   :  { %2514 = vmatpush1.bf16.msra.mxu1 %v3251_v53 }
  0x3b   :  { %346 = vmatmul.mubr.f32.vlgmr.msra.gmra.mrb[0].mxu0 %v3085_v1  ;;  %2548 = vmatprep.subr.bf16.mxu1 %v3159_v12 }
  0x3c   :  { %2518 = vmatpush1.bf16.msra.mxu0 %v3162_v16  ;;  %604 = vmatprep.mubr.f32.mxu0 %v3085_v1 }
  0x3d   :  { %417 = vmatmul.mubr.f32.vlgmr.msra.gmra.mrb[4].mxu1 %v3085_v1  ;;  %2520 = vmatprep.subr.bf16.mxu0 %v3168_v21 }
  0x3e   :  { %2550 = vmatpush1.bf16.msra.mxu1 %v3166_v20  ;;  %675 = vmatprep.mubr.f32.mxu1 %v3085_v1 }
  0x3f   :  { %2552 = vmatprep.subr.bf16.mxu1 %v3171_v25 }
  0x40   :  { %2522 = vmatpush1.bf16.msra.mxu0 %v3175_v29 }
  0x41   :  { %2524 = vmatprep.subr.bf16.mxu0 %v3180_v34 }
  0x42   :  { %2554 = vmatpush1.bf16.msra.mxu1 %v3178_v33 }
  0x43   :  { %2556 = vmatprep.subr.bf16.mxu1 %v3184_v38 }
  0x44   :  { %2526 = vmatpush1.bf16.msra.mxu0 %v3187_v42 }
  0x45   :  { %2528 = vmatprep.subr.bf16.mxu0 %v3190_v46 }
  0x46   :  { %2558 = vmatpush1.bf16.msra.mxu1 %v3193_v49 }
  0x47   :  { %2560 = vmatprep.subr.bf16.mxu1 %v3196_v52 }
  0x48   :  { %2530 = vmatpush1.bf16.msra.mxu0 %v3199_v55 }
  0x49   :  { %2532 = vmatprep.subr.bf16.mxu0 %v3202_v58 }
  0x4a   :  { %2562 = vmatpush1.bf16.msra.mxu1 %v3205_v61 }
  0x4b   :  { %2564 = vmatprep.subr.bf16.mxu1 %v3208_v0 }
  0x4c   :  { %2534 = vmatpush1.bf16.msra.mxu0 %v3211_v4 }
  0x4d   :  { %2536 = vmatprep.subr.bf16.mxu0 %v3214_v7 }
  0x4e   :  { %2566 = vmatpush1.bf16.msra.mxu1 %v3217_v10 }
  0x4f   :  { %2568 = vmatprep.subr.bf16.mxu1 %v3220_v15 }
  0x50   :  { %2538 = vmatpush1.bf16.msra.mxu0 %v3223_v19 }
  0x51   :  { %2540 = vmatprep.subr.bf16.mxu0 %v3226_v24 }
  0x52   :  { %2570 = vmatpush1.bf16.msra.mxu1 %v3229_v28 }
  0x53   :  { %2572 = vmatprep.subr.bf16.mxu1 %v3232_v32 }
  0x54   :  { %2542 = vmatpush1.bf16.msra.mxu0 %v3235_v37 }
  0x55   :  { %2544 = vmatprep.subr.bf16.mxu0 %v3238_v41 }
  0x56   :  { %2574 = vmatpush1.bf16.msra.mxu1 %v3241_v45 }
  0x57   :  { %2576 = vmatprep.subr.bf16.mxu1 %v3244_v47 }
  0x58   :  { %2546 = vmatpush1.bf16.msra.mxu0 %v3247_v51 }
  0x59   :  { %2580 = vmatprep.subr.bf16.mxu0 %v3157_v11 }
  0x5a   :  { %2578 = vmatpush1.bf16.msra.mxu1 %v3251_v53 }
  0x5b   :  { %2612 = vmatprep.subr.bf16.mxu1 %v3159_v12 }
  0xec   :  { %v136_v5 = vpop.f32.mrb[0].mxu1 }
  0xed   :  { %v137_v6 = vadd.f32 %v136_v5, %v49_v62  ;;  %v138_v8 = vpop.f32.mrb[1].mxu1 }
  0xee   :  { %v139_v13 = vadd.f32 %v138_v8, %v53_v2 }
  0xef   :  { %212 = vst [vmem:[#allocation2] sm:$0xff] %v137_v6 }
  0xf0   :  { %213 = vst [vmem:[#allocation2 + $0x8] sm:$0xff] %v139_v13  ;;  %v207_v17 = vpop.f32.mrb[2].mxu1 }
  0xf1   :  { %v208_v18 = vadd.f32 %v207_v17, %v57_v9  ;;  %v209_v22 = vpop.f32.mrb[3].mxu1 }
  0xf2   :  { %v210_v23 = vadd.f32 %v209_v22, %v61_v14 }
  0xf3   :  { %214 = vst [vmem:[#allocation2 + $0x10] sm:$0xff] %v208_v18 }
  0xf4   :  { %215 = vst [vmem:[#allocation2 + $0x18] sm:$0xff] %v210_v23 }
  0xfb   :  { %v216_v59 = vld [vmem:[#allocation2] ss:$8 sm:$0xf] }
 0x10e   :  { %v347_v35 = vpop.f32.mrb[0].mxu0 }
 0x10f   :  { %v349_v36 = vpop.f32.mrb[1].mxu0 }
 0x110   :  { %v418_v39 = vpop.f32.mrb[4].mxu1  ;;  %v427_v40 = vcombine.low %v347_v35, %v349_v36 }
 0x111   :  { %v420_v43 = vpop.f32.mrb[5].mxu1 }
 0x112   :  { %v435_v44 = vrot.slane %v427_v40, %v3297_v31  ;;  %v428_v48 = vcombine.low %v418_v39, %v420_v43 }
 0x114   :  { %v442_v50 = vrot.slane %v428_v48, %v3297_v31 }
 0x116   :  { %v443_v54 = vcombine.low %v435_v44, %v442_v50  ;;  %v475_v44 = vld [vmem:[#allocation2 + $0x1] ss:$8 sm:$0xf] }
 0x118   :  { %v450_v57 = vrot.slane %v443_v54, %v3297_v31 }
 0x11a   :  { %v452_v60 = vadd.f32 %v450_v57, %v216_v59 }
 0x11c   :  { %v2390_v62 = vmul.f32 -1.442695, %v452_v60  ;;  %v460_v2 = vrot.slane %v452_v60, 3 }
 0x11e   :  { %2994 = vpow2.f32 %v2390_v62 }
 0x128   :  { %v2995_v63 = vpop.eup %2994 }
 0x129   :  { %v456_v56 = vadd.f32 1.0, %v2995_v63 }
 0x12b   :  { %2996 = vrcp.f32 %v456_v56 }
 0x12c   :  { %2998 = vtanh.f32 %v460_v2 }
 0x135   :  { %v2997_v3 = vpop.eup %2996 }
 0x136   :  { %v464_v5 = vrot.slane %v2997_v3, 1  ;;  %v2999_v6 = vpop.eup %2998  ;;  %v470_v14 = vrot.slane %v2997_v3, 2 }
 0x137   :  { %v467_v8 = vmul.f32 %v2999_v6, %v2997_v3  ;;  %v1253_v6 = vld [vmem:[#allocation5] sm:$0xff] }
 0x138   :  { %v466_v9 = vmul.f32 0.0, %v464_v5 }
 0x13a   :  { %v3302_v13 = vadd.f32 %v467_v8, %v466_v9  ;;  %v1257_v8 = vld [vmem:[#allocation5 + $0x20] sm:$0xff] }
 0x13c   :  { %3000 = vtanh.f32 %v3302_v13 }
 0x146   :  { %v3001_v17 = vpop.eup %3000 }
 0x147   :  { %v472_v18 = vmul.f32 %v3001_v17, %v470_v14  ;;  %v1255_v14 = vld [vmem:[#allocation5 + $0x10] sm:$0xff] }
 0x148   :  { %v1259_v17 = vld [vmem:[#allocation5 + $0x30] sm:$0xff] }
 0x149   :  { %473 = vst [vmem:[#allocation3] sm:$0x1] %v472_v18  ;;  %605 = vmatmul.mubr.f32.vlgmr.msra.gmra.mrb[2].mxu0 %v472_v18  ;;  %676 = vmatmul.mubr.f32.vlgmr.msra.gmra.mrb[6].mxu1 %v472_v18  ;;  %v3394_v18 = vpack.c.bf16 %v1259_v17, %v1255_v14  ;;  %v1297_v14 = vld [vmem:[#allocation5 + $0x160] sm:$0xff]  ;;  %v1295_v17 = vld [vmem:[#allocation5 + $0x150] sm:$0xff] }
 0x14a   :  { %2582 = vmatpush1.bf16.msra.mxu0 %v3162_v16  ;;  %2614 = vmatpush1.bf16.msra.mxu1 %v3166_v20 }
 0x14b   :  { %2584 = vmatprep.subr.bf16.mxu0 %v3168_v21  ;;  %2616 = vmatprep.subr.bf16.mxu1 %v3171_v25 }
 0x14c   :  { %863 = vmatprep.mubr.f32.mxu0 %v3085_v1  ;;  %934 = vmatprep.mubr.f32.mxu1 %v3085_v1 }
 0x14e   :  { %2586 = vmatpush1.bf16.msra.mxu0 %v3175_v29  ;;  %2618 = vmatpush1.bf16.msra.mxu1 %v3178_v33 }
 0x14f   :  { %2588 = vmatprep.subr.bf16.mxu0 %v3180_v34  ;;  %2620 = vmatprep.subr.bf16.mxu1 %v3184_v38 }
 0x152   :  { %2590 = vmatpush1.bf16.msra.mxu0 %v3187_v42  ;;  %2622 = vmatpush1.bf16.msra.mxu1 %v3193_v49 }
 0x153   :  { %2592 = vmatprep.subr.bf16.mxu0 %v3190_v46  ;;  %2624 = vmatprep.subr.bf16.mxu1 %v3196_v52 }
 0x156   :  { %2594 = vmatpush1.bf16.msra.mxu0 %v3199_v55  ;;  %2626 = vmatpush1.bf16.msra.mxu1 %v3205_v61 }
 0x157   :  { %2596 = vmatprep.subr.bf16.mxu0 %v3202_v58  ;;  %2628 = vmatprep.subr.bf16.mxu1 %v3208_v0 }
 0x15a   :  { %2598 = vmatpush1.bf16.msra.mxu0 %v3211_v4  ;;  %2630 = vmatpush1.bf16.msra.mxu1 %v3217_v10 }
 0x15b   :  { %2600 = vmatprep.subr.bf16.mxu0 %v3214_v7  ;;  %2632 = vmatprep.subr.bf16.mxu1 %v3220_v15 }
 0x15e   :  { %2602 = vmatpush1.bf16.msra.mxu0 %v3223_v19  ;;  %2634 = vmatpush1.bf16.msra.mxu1 %v3229_v28 }
 0x15f   :  { %2604 = vmatprep.subr.bf16.mxu0 %v3226_v24  ;;  %2636 = vmatprep.subr.bf16.mxu1 %v3232_v32 }
 0x162   :  { %2606 = vmatpush1.bf16.msra.mxu0 %v3235_v37  ;;  %2638 = vmatpush1.bf16.msra.mxu1 %v3241_v45 }
 0x163   :  { %2608 = vmatprep.subr.bf16.mxu0 %v3238_v41  ;;  %2640 = vmatprep.subr.bf16.mxu1 %v3244_v47 }
 0x166   :  { %2610 = vmatpush1.bf16.msra.mxu0 %v3247_v51  ;;  %2642 = vmatpush1.bf16.msra.mxu1 %v3251_v53 }
 0x167   :  { %2644 = vmatprep.subr.bf16.mxu0 %v3157_v11  ;;  %2676 = vmatprep.subr.bf16.mxu1 %v3159_v12 }
 0x21c   :  { %v606_v22 = vpop.f32.mrb[2].mxu0  ;;  %v677_v23 = vpop.f32.mrb[6].mxu1 }
 0x21d   :  { %v608_v26 = vpop.f32.mrb[3].mxu0  ;;  %v679_v27 = vpop.f32.mrb[7].mxu1 }
 0x21e   :  { %v686_v30 = vcombine.low %v606_v22, %v608_v26  ;;  %v687_v35 = vcombine.low %v677_v23, %v679_v27  ;;  %v1262_v22 = vld [vmem:[#allocation5 + $0x48] sm:$0xff]  ;;  %v1264_v26 = vld [vmem:[#allocation5 + $0x58] sm:$0xff] }
 0x21f   :  { %v1266_v23 = vld [vmem:[#allocation5 + $0x68] sm:$0xff] }
 0x220   :  { %v694_v36 = vrot.slane %v686_v30, %v3297_v31  ;;  %v701_v39 = vrot.slane %v687_v35, %v3297_v31  ;;  %v3399_v27 = vpack.c.bf16 %v1266_v23, %v1262_v22  ;;  %v1268_v30 = vld [vmem:[#allocation5 + $0x78] sm:$0xff]  ;;  %v1261_v35 = vld [vmem:[#allocation5 + $0x40] sm:$0xff]  ;;  %v1299_v23 = vld [vmem:[#allocation5 + $0x170] sm:$0xff] }
 0x222   :  { %v702_v40 = vcombine.low %v694_v36, %v701_v39  ;;  %v1265_v36 = vld [vmem:[#allocation5 + $0x60] sm:$0xff]  ;;  %v3401_v39 = vpack.c.bf16 %v1268_v30, %v1264_v26  ;;  %v1302_v26 = vld [vmem:[#allocation5 + $0x188] sm:$0xff] }
 0x223   :  { %v1306_v30 = vld [vmem:[#allocation5 + $0x1a8] sm:$0xff] }
 0x224   :  { %v709_v43 = vrot.slane %v702_v40, %v3297_v31  ;;  %v3403_v40 = vpack.c.bf16 %v1265_v36, %v1261_v35  ;;  %v3454_v35 = vpack.c.bf16 %v1299_v23, %v1295_v17  ;;  %v3456_v36 = vpack.c.bf16 %v1306_v30, %v1302_v26 }
 0x226   :  { %v711_v48 = vadd.f32 %v709_v43, %v475_v44  ;;  %v1263_v43 = vld [vmem:[#allocation5 + $0x50] sm:$0xff] }
 0x227   :  { %v1267_v44 = vld [vmem:[#allocation5 + $0x70] sm:$0xff] }
 0x228   :  { %v2391_v50 = vmul.f32 -1.442695, %v711_v48  ;;  %v719_v12 = vrot.slane %v711_v48, 3  ;;  %v3406_v48 = vpack.c.bf16 %v1267_v44, %v1263_v43  ;;  %v1304_v43 = vld [vmem:[#allocation5 + $0x198] sm:$0xff] }
 0x229   :  { %v1308_v44 = vld [vmem:[#allocation5 + $0x1b8] sm:$0xff] }
 0x22a   :  { %3002 = vpow2.f32 %v2391_v50  ;;  %v1270_v50 = vld [vmem:[#allocation5 + $0x88] sm:$0xff] }
 0x234   :  { %v3003_v11 = vpop.eup %3002 }
 0x235   :  { %v715_v54 = vadd.f32 1.0, %v3003_v11  ;;  %v1274_v11 = vld [vmem:[#allocation5 + $0xa8] sm:$0xff] }
 0x237   :  { %3004 = vrcp.f32 %v715_v54  ;;  %v1272_v54 = vld [vmem:[#allocation5 + $0x98] sm:$0xff] }
 0x238   :  { %3006 = vtanh.f32 %v719_v12  ;;  %v3411_v12 = vpack.c.bf16 %v1274_v11, %v1270_v50  ;;  %v1301_v50 = vld [vmem:[#allocation5 + $0x180] sm:$0xff]  ;;  %v3459_v11 = vpack.c.bf16 %v1308_v44, %v1304_v43 }
 0x241   :  { %v3005_v57 = vpop.eup %3004 }
 0x242   :  { %v723_v59 = vrot.slane %v3005_v57, 1  ;;  %v3007_v60 = vpop.eup %3006  ;;  %v729_v2 = vrot.slane %v3005_v57, 2 }
 0x243   :  { %v726_v62 = vmul.f32 %v3007_v60, %v3005_v57  ;;  %v1276_v57 = vld [vmem:[#allocation5 + $0xb8] sm:$0xff]  ;;  %v1273_v60 = vld [vmem:[#allocation5 + $0xa0] sm:$0xff] }
 0x244   :  { %v725_v63 = vmul.f32 %v723_v59, %v3302_v13  ;;  %v3391_v13 = vpack.c.bf16 %v1257_v8, %v1253_v6  ;;  %v1269_v59 = vld [vmem:[#allocation5 + $0x80] sm:$0xff] }
 0x245   :  { %v1293_v8 = vld [vmem:[#allocation5 + $0x140] sm:$0xff] }
 0x246   :  { %v3343_v56 = vadd.f32 %v726_v62, %v725_v63  ;;  %v3413_v62 = vpack.c.bf16 %v1276_v57, %v1272_v54  ;;  %v3415_v63 = vpack.c.bf16 %v1273_v60, %v1269_v59  ;;  %v3450_v22 = vpack.c.bf16 %v1297_v14, %v1293_v8  ;;  %v1305_v54 = vld [vmem:[#allocation5 + $0x1a0] sm:$0xff]  ;;  %v1303_v57 = vld [vmem:[#allocation5 + $0x190] sm:$0xff]  ;;  %v1310_v60 = vld [vmem:[#allocation5 + $0x1c8] sm:$0xff] }
 0x247   :  { %v1307_v59 = vld [vmem:[#allocation5 + $0x1b0] sm:$0xff] }
 0x248   :  { %3008 = vtanh.f32 %v3343_v56  ;;  %v993_v14 = vld [vmem:[#allocation2 + $0x3] ss:$8 sm:$0xf] }
 0x252   :  { %v3009_v3 = vpop.eup %3008 }
 0x253   :  { %v731_v5 = vmul.f32 %v3009_v3, %v729_v2  ;;  %v1275_v2 = vld [vmem:[#allocation5 + $0xb0] sm:$0xff] }
 0x255   :  { %732 = vst [vmem:[#allocation3 + $0x1] sm:$0x1] %v731_v5  ;;  %864 = vmatmul.mubr.f32.vlgmr.msra.gmra.mrb[4].mxu0 %v731_v5  ;;  %935 = vmatmul.mubr.f32.vlgmr.msra.gmra.mrb[8].mxu1 %v731_v5  ;;  %v1278_v5 = vld [vmem:[#allocation5 + $0xc8] sm:$0xff] }
 0x256   :  { %2646 = vmatpush1.bf16.msra.mxu0 %v3162_v16  ;;  %2678 = vmatpush1.bf16.msra.mxu1 %v3166_v20 }
 0x257   :  { %2648 = vmatprep.subr.bf16.mxu0 %v3168_v21  ;;  %2680 = vmatprep.subr.bf16.mxu1 %v3171_v25 }
 0x258   :  { %1122 = vmatprep.mubr.f32.mxu0 %v3085_v1  ;;  %1193 = vmatprep.mubr.f32.mxu1 %v3085_v1 }
 0x25a   :  { %2650 = vmatpush1.bf16.msra.mxu0 %v3175_v29  ;;  %2682 = vmatpush1.bf16.msra.mxu1 %v3178_v33 }
 0x25b   :  { %2652 = vmatprep.subr.bf16.mxu0 %v3180_v34  ;;  %2684 = vmatprep.subr.bf16.mxu1 %v3184_v38 }
 0x25e   :  { %2654 = vmatpush1.bf16.msra.mxu0 %v3187_v42  ;;  %2686 = vmatpush1.bf16.msra.mxu1 %v3193_v49  ;;  %v734_v49 = vld [vmem:[#allocation2 + $0x2] ss:$8 sm:$0xf] }
 0x25f   :  { %2656 = vmatprep.subr.bf16.mxu0 %v3190_v46  ;;  %2688 = vmatprep.subr.bf16.mxu1 %v3196_v52 }
 0x262   :  { %2658 = vmatpush1.bf16.msra.mxu0 %v3199_v55  ;;  %2690 = vmatpush1.bf16.msra.mxu1 %v3205_v61 }
 0x263   :  { %2660 = vmatprep.subr.bf16.mxu0 %v3202_v58  ;;  %2692 = vmatprep.subr.bf16.mxu1 %v3208_v0 }
 0x266   :  { %2662 = vmatpush1.bf16.msra.mxu0 %v3211_v4  ;;  %2694 = vmatpush1.bf16.msra.mxu1 %v3217_v10 }
 0x267   :  { %2664 = vmatprep.subr.bf16.mxu0 %v3214_v7  ;;  %2696 = vmatprep.subr.bf16.mxu1 %v3220_v15 }
 0x26a   :  { %2666 = vmatpush1.bf16.msra.mxu0 %v3223_v19  ;;  %2698 = vmatpush1.bf16.msra.mxu1 %v3229_v28 }
 0x26b   :  { %2668 = vmatprep.subr.bf16.mxu0 %v3226_v24  ;;  %2700 = vmatprep.subr.bf16.mxu1 %v3232_v32 }
 0x26e   :  { %2670 = vmatpush1.bf16.msra.mxu0 %v3235_v37  ;;  %2702 = vmatpush1.bf16.msra.mxu1 %v3241_v45  ;;  %v1258_v45 = vld [vmem:[#allocation5 + $0x28] sm:$0xff] }
 0x26f   :  { %2672 = vmatprep.subr.bf16.mxu0 %v3238_v41  ;;  %2704 = vmatprep.subr.bf16.mxu1 %v3244_v47  ;;  %v1254_v41 = vld [vmem:[#allocation5 + $0x8] sm:$0xff]  ;;  %v1256_v47 = vld [vmem:[#allocation5 + $0x18] sm:$0xff] }
 0x272   :  { %2674 = vmatpush1.bf16.msra.mxu0 %v3247_v51  ;;  %2706 = vmatpush1.bf16.msra.mxu1 %v3251_v53  ;;  %v3387_v51 = vpack.c.bf16 %v1258_v45, %v1254_v41  ;;  %v1260_v53 = vld [vmem:[#allocation5 + $0x38] sm:$0xff]  ;;  %v1298_v41 = vld [vmem:[#allocation5 + $0x168] sm:$0xff] }
 0x273   :  { %v3389_v9 = vpack.c.bf16 %v1260_v53, %v1256_v47  ;;  %v1296_v45 = vld [vmem:[#allocation5 + $0x158] sm:$0xff] }
 0x274   :  { %2708 = vmatprep.subr.bf16.mxu0 %v3387_v51  ;;  %v1300_v47 = vld [vmem:[#allocation5 + $0x178] sm:$0xff] }
 0x275   :  { %2740 = vmatprep.subr.bf16.mxu1 %v3389_v9  ;;  %v3447_v6 = vpack.c.bf16 %v1300_v47, %v1296_v45 }
 0x328   :  { %v865_v16 = vpop.f32.mrb[4].mxu0  ;;  %v936_v20 = vpop.f32.mrb[8].mxu1 }
 0x329   :  { %v867_v21 = vpop.f32.mrb[5].mxu0  ;;  %v938_v25 = vpop.f32.mrb[9].mxu1 }
 0x32a   :  { %v945_v29 = vcombine.low %v865_v16, %v867_v21  ;;  %v946_v33 = vcombine.low %v936_v20, %v938_v25  ;;  %v1282_v16 = vld [vmem:[#allocation5 + $0xe8] sm:$0xff]  ;;  %v1280_v20 = vld [vmem:[#allocation5 + $0xd8] sm:$0xff] }
 0x32b   :  { %v3423_v21 = vpack.c.bf16 %v1282_v16, %v1278_v5  ;;  %v1284_v25 = vld [vmem:[#allocation5 + $0xf8] sm:$0xff]  ;;  %v3462_v5 = vpack.c.bf16 %v1305_v54, %v1301_v50 }
 0x32c   :  { %v953_v34 = vrot.slane %v945_v29, %v3297_v31  ;;  %v960_v38 = vrot.slane %v946_v33, %v3297_v31  ;;  %v1277_v29 = vld [vmem:[#allocation5 + $0xc0] sm:$0xff]  ;;  %v1316_v16 = vld [vmem:[#allocation5 + $0x1f8] sm:$0xff] }
 0x32d   :  { %v1281_v33 = vld [vmem:[#allocation5 + $0xe0] sm:$0xff] }
 0x32e   :  { %v961_v42 = vcombine.low %v953_v34, %v960_v38  ;;  %v3425_v34 = vpack.c.bf16 %v1284_v25, %v1280_v20  ;;  %v3427_v38 = vpack.c.bf16 %v1281_v33, %v1277_v29  ;;  %v3466_v20 = vpack.c.bf16 %v1307_v59, %v1303_v57  ;;  %v1309_v29 = vld [vmem:[#allocation5 + $0x1c0] sm:$0xff] }
 0x32f   :  { %v1313_v33 = vld [vmem:[#allocation5 + $0x1e0] sm:$0xff] }
 0x330   :  { %v968_v46 = vrot.slane %v961_v42, %v3297_v31  ;;  %v1279_v42 = vld [vmem:[#allocation5 + $0xd0] sm:$0xff] }
 0x332   :  { %v970_v52 = vadd.f32 %v968_v46, %v734_v49  ;;  %v1283_v46 = vld [vmem:[#allocation5 + $0xf0] sm:$0xff] }
 0x333   :  { %v3430_v49 = vpack.c.bf16 %v1283_v46, %v1279_v42  ;;  %v1311_v46 = vld [vmem:[#allocation5 + $0x1d0] sm:$0xff] }
 0x334   :  { %v2392_v55 = vmul.f32 -1.442695, %v970_v52  ;;  %v978_v0 = vrot.slane %v970_v52, 3  ;;  %v1286_v52 = vld [vmem:[#allocation5 + $0x108] sm:$0xff] }
 0x336   :  { %3010 = vpow2.f32 %v2392_v55  ;;  %v1290_v55 = vld [vmem:[#allocation5 + $0x128] sm:$0xff] }
 0x340   :  { %v3011_v58 = vpop.eup %3010 }
 0x341   :  { %v974_v61 = vadd.f32 1.0, %v3011_v58  ;;  %v1288_v58 = vld [vmem:[#allocation5 + $0x118] sm:$0xff] }
 0x343   :  { %3012 = vrcp.f32 %v974_v61  ;;  %v3434_v61 = vpack.c.bf16 %v1290_v55, %v1286_v52  ;;  %v1315_v52 = vld [vmem:[#allocation5 + $0x1f0] sm:$0xff]  ;;  %v3474_v55 = vpack.c.bf16 %v1313_v33, %v1309_v29 }
 0x344   :  { %3014 = vtanh.f32 %v978_v0  ;;  %v1292_v0 = vld [vmem:[#allocation5 + $0x138] sm:$0xff] }
 0x34d   :  { %v3013_v4 = vpop.eup %3012 }
 0x34e   :  { %v982_v7 = vrot.slane %v3013_v4, 1  ;;  %v3015_v10 = vpop.eup %3014  ;;  %v988_v28 = vrot.slane %v3013_v4, 2 }
 0x34f   :  { %v985_v15 = vmul.f32 %v3015_v10, %v3013_v4  ;;  %v1285_v4 = vld [vmem:[#allocation5 + $0x100] sm:$0xff]  ;;  %v3437_v10 = vpack.c.bf16 %v1292_v0, %v1288_v58  ;;  %v3478_v58 = vpack.c.bf16 %v1315_v52, %v1311_v46 }
 0x350   :  { %v984_v19 = vmul.f32 %v982_v7, %v3343_v56  ;;  %v1271_v56 = vld [vmem:[#allocation5 + $0x90] sm:$0xff]  ;;  %v1289_v7 = vld [vmem:[#allocation5 + $0x120] sm:$0xff] }
 0x351   :  { %v3418_v3 = vpack.c.bf16 %v1275_v2, %v1271_v56  ;;  %v1314_v56 = vld [vmem:[#allocation5 + $0x1e8] sm:$0xff]  ;;  %v1312_v2 = vld [vmem:[#allocation5 + $0x1d8] sm:$0xff] }
 0x352   :  { %v3382_v24 = vadd.f32 %v985_v15, %v984_v19  ;;  %v3439_v15 = vpack.c.bf16 %v1289_v7, %v1285_v4  ;;  %v1287_v19 = vld [vmem:[#allocation5 + $0x110] sm:$0xff]  ;;  %v3468_v25 = vpack.c.bf16 %v1314_v56, %v1310_v60  ;;  %v3471_v42 = vpack.c.bf16 %v1316_v16, %v1312_v2 }
 0x354   :  { %3016 = vtanh.f32 %v3382_v24 }
 0x35e   :  { %v3017_v32 = vpop.eup %3016 }
 0x35f   :  { %v990_v37 = vmul.f32 %v3017_v32, %v988_v28  ;;  %v1291_v28 = vld [vmem:[#allocation5 + $0x130] sm:$0xff]  ;;  %v1294_v32 = vld [vmem:[#allocation5 + $0x148] sm:$0xff] }
 0x360   :  { %v3445_v53 = vpack.c.bf16 %v1298_v41, %v1294_v32 }
 0x361   :  { %991 = vst [vmem:[#allocation3 + $0x2] sm:$0x1] %v990_v37  ;;  %1123 = vmatmul.mubr.f32.vlgmr.msra.gmra.mrb[6].mxu0 %v990_v37  ;;  %1194 = vmatmul.mubr.f32.vlgmr.msra.gmra.mrb[10].mxu1 %v990_v37  ;;  %v3442_v37 = vpack.c.bf16 %v1291_v28, %v1287_v19 }
 0x362   :  { %1381 = vmatprep.mubr.f32.mxu0 %v3085_v1  ;;  %1452 = vmatprep.mubr.f32.mxu1 %v3085_v1 }
 0x363   :  { %2710 = vmatpush1.bf16.msra.mxu0 %v3391_v13  ;;  %2742 = vmatpush1.bf16.msra.mxu1 %v3394_v18 }
 0x364   :  { %2712 = vmatprep.subr.bf16.mxu0 %v3399_v27  ;;  %2744 = vmatprep.subr.bf16.mxu1 %v3401_v39 }
 0x367   :  { %2714 = vmatpush1.bf16.msra.mxu0 %v3403_v40  ;;  %2746 = vmatpush1.bf16.msra.mxu1 %v3406_v48 }
 0x368   :  { %2716 = vmatprep.subr.bf16.mxu0 %v3411_v12  ;;  %2748 = vmatprep.subr.bf16.mxu1 %v3413_v62 }
 0x36b   :  { %2718 = vmatpush1.bf16.msra.mxu0 %v3415_v63  ;;  %2750 = vmatpush1.bf16.msra.mxu1 %v3418_v3 }
 0x36c   :  { %2720 = vmatprep.subr.bf16.mxu0 %v3423_v21  ;;  %2752 = vmatprep.subr.bf16.mxu1 %v3425_v34 }
 0x36f   :  { %2722 = vmatpush1.bf16.msra.mxu0 %v3427_v38  ;;  %2754 = vmatpush1.bf16.msra.mxu1 %v3430_v49 }
 0x370   :  { %2724 = vmatprep.subr.bf16.mxu0 %v3434_v61  ;;  %2756 = vmatprep.subr.bf16.mxu1 %v3437_v10 }
 0x373   :  { %2726 = vmatpush1.bf16.msra.mxu0 %v3439_v15  ;;  %2758 = vmatpush1.bf16.msra.mxu1 %v3442_v37 }
 0x374   :  { %2728 = vmatprep.subr.bf16.mxu0 %v3445_v53  ;;  %2760 = vmatprep.subr.bf16.mxu1 %v3447_v6 }
 0x377   :  { %2730 = vmatpush1.bf16.msra.mxu0 %v3450_v22  ;;  %2762 = vmatpush1.bf16.msra.mxu1 %v3454_v35 }
 0x378   :  { %2732 = vmatprep.subr.bf16.mxu0 %v3456_v36  ;;  %2764 = vmatprep.subr.bf16.mxu1 %v3459_v11 }
 0x37b   :  { %2734 = vmatpush1.bf16.msra.mxu0 %v3462_v5  ;;  %2766 = vmatpush1.bf16.msra.mxu1 %v3466_v20 }
 0x37c   :  { %2736 = vmatprep.subr.bf16.mxu0 %v3468_v25  ;;  %2768 = vmatprep.subr.bf16.mxu1 %v3471_v42 }
 0x37f   :  { %2738 = vmatpush1.bf16.msra.mxu0 %v3474_v55  ;;  %2770 = vmatpush1.bf16.msra.mxu1 %v3478_v58 }
 0x380   :  { %2772 = vmatprep.subr.bf16.mxu0 %v3387_v51  ;;  %2804 = vmatprep.subr.bf16.mxu1 %v3389_v9 }
 0x434   :  { %v1124_v0 = vpop.f32.mrb[6].mxu0  ;;  %v1195_v4 = vpop.f32.mrb[10].mxu1 }
 0x435   :  { %v1126_v7 = vpop.f32.mrb[7].mxu0  ;;  %v1197_v19 = vpop.f32.mrb[11].mxu1 }
 0x436   :  { %v1204_v28 = vcombine.low %v1124_v0, %v1126_v7  ;;  %v1205_v32 = vcombine.low %v1195_v4, %v1197_v19 }
 0x438   :  { %v1212_v41 = vrot.slane %v1204_v28, %v3297_v31  ;;  %v1219_v45 = vrot.slane %v1205_v32, %v3297_v31  ;;  %v1252_v32 = vld [vmem:[#allocation2 + $0x4] ss:$8 sm:$0xf] }
 0x43a   :  { %v1220_v47 = vcombine.low %v1212_v41, %v1219_v45 }
 0x43c   :  { %v1227_v8 = vrot.slane %v1220_v47, %v3297_v31 }
 0x43e   :  { %v1229_v17 = vadd.f32 %v1227_v8, %v993_v14 }
 0x440   :  { %v2393_v23 = vmul.f32 -1.442695, %v1229_v17  ;;  %v1237_v43 = vrot.slane %v1229_v17, 3 }
 0x442   :  { %3018 = vpow2.f32 %v2393_v23 }
 0x44c   :  { %v3019_v26 = vpop.eup %3018 }
 0x44d   :  { %v1233_v30 = vadd.f32 1.0, %v3019_v26 }
 0x44f   :  { %3020 = vrcp.f32 %v1233_v30 }
 0x450   :  { %3022 = vtanh.f32 %v1237_v43 }
 0x459   :  { %v3021_v44 = vpop.eup %3020 }
 0x45a   :  { %v1241_v50 = vrot.slane %v3021_v44, 1  ;;  %v3023_v54 = vpop.eup %3022  ;;  %v1247_v56 = vrot.slane %v3021_v44, 2 }
 0x45b   :  { %v1244_v57 = vmul.f32 %v3023_v54, %v3021_v44 }
 0x45c   :  { %v1243_v59 = vmul.f32 %v1241_v50, %v3382_v24 }
 0x45e   :  { %v3489_v60 = vadd.f32 %v1244_v57, %v1243_v59 }
 0x460   :  { %3024 = vtanh.f32 %v3489_v60 }
 0x46a   :  { %v3025_v2 = vpop.eup %3024 }
 0x46b   :  { %v1249_v16 = vmul.f32 %v3025_v2, %v1247_v56 }
 0x46d   :  { %1250 = vst [vmem:[#allocation3 + $0x3] sm:$0x1] %v1249_v16  ;;  %1382 = vmatmul.mubr.f32.vlgmr.msra.gmra.mrb[8].mxu0 %v1249_v16  ;;  %1453 = vmatmul.mubr.f32.vlgmr.msra.gmra.mrb[12].mxu1 %v1249_v16 }
 0x46e   :  { %2774 = vmatpush1.bf16.msra.mxu0 %v3391_v13  ;;  %2806 = vmatpush1.bf16.msra.mxu1 %v3394_v18 }
 0x46f   :  { %2776 = vmatprep.subr.bf16.mxu0 %v3399_v27  ;;  %2808 = vmatprep.subr.bf16.mxu1 %v3401_v39 }
 0x470   :  { %1640 = vmatprep.mubr.f32.mxu0 %v3085_v1  ;;  %1711 = vmatprep.mubr.f32.mxu1 %v3085_v1 }
 0x472   :  { %2778 = vmatpush1.bf16.msra.mxu0 %v3403_v40  ;;  %2810 = vmatpush1.bf16.msra.mxu1 %v3406_v48 }
 0x473   :  { %2780 = vmatprep.subr.bf16.mxu0 %v3411_v12  ;;  %2812 = vmatprep.subr.bf16.mxu1 %v3413_v62 }
 0x476   :  { %2782 = vmatpush1.bf16.msra.mxu0 %v3415_v63  ;;  %2814 = vmatpush1.bf16.msra.mxu1 %v3418_v3 }
 0x477   :  { %2784 = vmatprep.subr.bf16.mxu0 %v3423_v21  ;;  %2816 = vmatprep.subr.bf16.mxu1 %v3425_v34 }
 0x47a   :  { %2786 = vmatpush1.bf16.msra.mxu0 %v3427_v38  ;;  %2818 = vmatpush1.bf16.msra.mxu1 %v3430_v49 }
 0x47b   :  { %2788 = vmatprep.subr.bf16.mxu0 %v3434_v61  ;;  %2820 = vmatprep.subr.bf16.mxu1 %v3437_v10 }
 0x47e   :  { %2790 = vmatpush1.bf16.msra.mxu0 %v3439_v15  ;;  %2822 = vmatpush1.bf16.msra.mxu1 %v3442_v37 }
 0x47f   :  { %2792 = vmatprep.subr.bf16.mxu0 %v3445_v53  ;;  %2824 = vmatprep.subr.bf16.mxu1 %v3447_v6 }
 0x482   :  { %2794 = vmatpush1.bf16.msra.mxu0 %v3450_v22  ;;  %2826 = vmatpush1.bf16.msra.mxu1 %v3454_v35 }
 0x483   :  { %2796 = vmatprep.subr.bf16.mxu0 %v3456_v36  ;;  %2828 = vmatprep.subr.bf16.mxu1 %v3459_v11 }
 0x486   :  { %2798 = vmatpush1.bf16.msra.mxu0 %v3462_v5  ;;  %2830 = vmatpush1.bf16.msra.mxu1 %v3466_v20 }
 0x487   :  { %2800 = vmatprep.subr.bf16.mxu0 %v3468_v25  ;;  %2832 = vmatprep.subr.bf16.mxu1 %v3471_v42 }
 0x48a   :  { %2802 = vmatpush1.bf16.msra.mxu0 %v3474_v55  ;;  %2834 = vmatpush1.bf16.msra.mxu1 %v3478_v58 }
 0x48b   :  { %2836 = vmatprep.subr.bf16.mxu0 %v3387_v51  ;;  %2868 = vmatprep.subr.bf16.mxu1 %v3389_v9 }
 0x540   :  { %v1383_v24 = vpop.f32.mrb[8].mxu0  ;;  %v1454_v29 = vpop.f32.mrb[12].mxu1 }
 0x541   :  { %v1385_v33 = vpop.f32.mrb[9].mxu0  ;;  %v1456_v46 = vpop.f32.mrb[13].mxu1 }
 0x542   :  { %v1463_v52 = vcombine.low %v1383_v24, %v1385_v33  ;;  %v1464_v0 = vcombine.low %v1454_v29, %v1456_v46 }
 0x544   :  { %v1471_v4 = vrot.slane %v1463_v52, %v3297_v31  ;;  %v1478_v7 = vrot.slane %v1464_v0, %v3297_v31  ;;  %v1511_v0 = vld [vmem:[#allocation2 + $0x5] ss:$8 sm:$0xf] }
 0x546   :  { %v1479_v19 = vcombine.low %v1471_v4, %v1478_v7 }
 0x548   :  { %v1486_v28 = vrot.slane %v1479_v19, %v3297_v31 }
 0x54a   :  { %v1488_v41 = vadd.f32 %v1486_v28, %v1252_v32 }
 0x54c   :  { %v2394_v45 = vmul.f32 -1.442695, %v1488_v41  ;;  %v1496_v14 = vrot.slane %v1488_v41, 3 }
 0x54e   :  { %3026 = vpow2.f32 %v2394_v45 }
 0x558   :  { %v3027_v47 = vpop.eup %3026 }
 0x559   :  { %v1492_v8 = vadd.f32 1.0, %v3027_v47 }
 0x55b   :  { %3028 = vrcp.f32 %v1492_v8 }
 0x55c   :  { %3030 = vtanh.f32 %v1496_v14 }
 0x565   :  { %v3029_v17 = vpop.eup %3028 }
 0x566   :  { %v1500_v23 = vrot.slane %v3029_v17, 1  ;;  %v3031_v26 = vpop.eup %3030  ;;  %v1506_v50 = vrot.slane %v3029_v17, 2 }
 0x567   :  { %v1503_v30 = vmul.f32 %v3031_v26, %v3029_v17  ;;  %v2291_v26 = vld [vmem:[%s3673_s4 + $0x18] sm:$0xff] }
 0x568   :  { %v1502_v43 = vmul.f32 %v1500_v23, %v3489_v60 }
 0x56a   :  { %v3530_v44 = vadd.f32 %v1503_v30, %v1502_v43  ;;  %v2292_v43 = vld [vmem:[%s3673_s4 + $0x20] sm:$0xff] }
 0x56c   :  { %3032 = vtanh.f32 %v3530_v44 }
 0x576   :  { %v3033_v54 = vpop.eup %3032 }
 0x577   :  { %v1508_v57 = vmul.f32 %v3033_v54, %v1506_v50  ;;  %v2294_v54 = vld [vmem:[%s3673_s4 + $0x30] sm:$0xff] }
 0x579   :  { %1509 = vst [vmem:[#allocation3 + $0x4] sm:$0x1] %v1508_v57  ;;  %1641 = vmatmul.mubr.f32.vlgmr.msra.gmra.mrb[10].mxu0 %v1508_v57  ;;  %1712 = vmatmul.mubr.f32.vlgmr.msra.gmra.mrb[14].mxu1 %v1508_v57  ;;  %v2295_v57 = vld [vmem:[%s3673_s4 + $0x38] sm:$0xff] }
 0x57a   :  { %2838 = vmatpush1.bf16.msra.mxu0 %v3391_v13  ;;  %2870 = vmatpush1.bf16.msra.mxu1 %v3394_v18 }
 0x57b   :  { %2840 = vmatprep.subr.bf16.mxu0 %v3399_v27  ;;  %2872 = vmatprep.subr.bf16.mxu1 %v3401_v39 }
 0x57c   :  { %1899 = vmatprep.mubr.f32.mxu0 %v3085_v1  ;;  %1970 = vmatprep.mubr.f32.mxu1 %v3085_v1 }
 0x57e   :  { %2842 = vmatpush1.bf16.msra.mxu0 %v3403_v40  ;;  %2874 = vmatpush1.bf16.msra.mxu1 %v3406_v48 }
 0x57f   :  { %2844 = vmatprep.subr.bf16.mxu0 %v3411_v12  ;;  %2876 = vmatprep.subr.bf16.mxu1 %v3413_v62 }
 0x582   :  { %2846 = vmatpush1.bf16.msra.mxu0 %v3415_v63  ;;  %2878 = vmatpush1.bf16.msra.mxu1 %v3418_v3 }
 0x583   :  { %2848 = vmatprep.subr.bf16.mxu0 %v3423_v21  ;;  %2880 = vmatprep.subr.bf16.mxu1 %v3425_v34 }
 0x586   :  { %2850 = vmatpush1.bf16.msra.mxu0 %v3427_v38  ;;  %2882 = vmatpush1.bf16.msra.mxu1 %v3430_v49 }
 0x587   :  { %2852 = vmatprep.subr.bf16.mxu0 %v3434_v61  ;;  %2884 = vmatprep.subr.bf16.mxu1 %v3437_v10 }
 0x58a   :  { %2854 = vmatpush1.bf16.msra.mxu0 %v3439_v15  ;;  %2886 = vmatpush1.bf16.msra.mxu1 %v3442_v37 }
 0x58b   :  { %2856 = vmatprep.subr.bf16.mxu0 %v3445_v53  ;;  %2888 = vmatprep.subr.bf16.mxu1 %v3447_v6 }
 0x58e   :  { %2858 = vmatpush1.bf16.msra.mxu0 %v3450_v22  ;;  %2890 = vmatpush1.bf16.msra.mxu1 %v3454_v35 }
 0x58f   :  { %2860 = vmatprep.subr.bf16.mxu0 %v3456_v36  ;;  %2892 = vmatprep.subr.bf16.mxu1 %v3459_v11 }
 0x592   :  { %2862 = vmatpush1.bf16.msra.mxu0 %v3462_v5  ;;  %2894 = vmatpush1.bf16.msra.mxu1 %v3466_v20 }
 0x593   :  { %2864 = vmatprep.subr.bf16.mxu0 %v3468_v25  ;;  %2896 = vmatprep.subr.bf16.mxu1 %v3471_v42 }
 0x596   :  { %2866 = vmatpush1.bf16.msra.mxu0 %v3474_v55  ;;  %2898 = vmatpush1.bf16.msra.mxu1 %v3478_v58 }
 0x597   :  { %2900 = vmatprep.subr.bf16.mxu0 %v3387_v51  ;;  %2932 = vmatprep.subr.bf16.mxu1 %v3389_v9 }
 0x64c   :  { %v1642_v59 = vpop.f32.mrb[10].mxu0  ;;  %v1713_v60 = vpop.f32.mrb[14].mxu1 }
 0x64d   :  { %v1644_v56 = vpop.f32.mrb[11].mxu0  ;;  %v1715_v2 = vpop.f32.mrb[15].mxu1 }
 0x64e   :  { %v1722_v16 = vcombine.low %v1642_v59, %v1644_v56  ;;  %v1723_v24 = vcombine.low %v1713_v60, %v1715_v2  ;;  %v2973_v59 = vpack.c.bf16 %v2295_v57, %v2294_v54  ;;  %v2296_v60 = vld [vmem:[%s3673_s4 + $0x40] sm:$0xff]  ;;  %v2297_v56 = vld [vmem:[%s3673_s4 + $0x48] sm:$0xff] }
 0x64f   :  { %v2976_v2 = vpack.c.bf16 %v2297_v56, %v2296_v60 }
 0x650   :  { %v1730_v29 = vrot.slane %v1722_v16, %v3297_v31  ;;  %v1737_v33 = vrot.slane %v1723_v24, %v3297_v31  ;;  %v2298_v16 = vld [vmem:[%s3673_s4 + $0x50] sm:$0xff]  ;;  %v2299_v24 = vld [vmem:[%s3673_s4 + $0x58] sm:$0xff] }
 0x652   :  { %v1738_v46 = vcombine.low %v1730_v29, %v1737_v33  ;;  %v2979_v29 = vpack.c.bf16 %v2299_v24, %v2298_v16  ;;  %v2300_v33 = vld [vmem:[%s3673_s4 + $0x60] sm:$0xff] }
 0x654   :  { %v1745_v52 = vrot.slane %v1738_v46, %v3297_v31  ;;  %v2301_v46 = vld [vmem:[%s3673_s4 + $0x68] sm:$0xff] }
 0x656   :  { %v1747_v4 = vadd.f32 %v1745_v52, %v1511_v0  ;;  %v2302_v52 = vld [vmem:[%s3673_s4 + $0x70] sm:$0xff]  ;;  %v2982_v0 = vpack.c.bf16 %v2301_v46, %v2300_v33 }
 0x658   :  { %v2395_v7 = vmul.f32 -1.442695, %v1747_v4  ;;  %v1755_v9 = vrot.slane %v1747_v4, 3  ;;  %v2303_v4 = vld [vmem:[%s3673_s4 + $0x78] sm:$0xff] }
 0x65a   :  { %3034 = vpow2.f32 %v2395_v7  ;;  %v2985_v7 = vpack.c.bf16 %v2303_v4, %v2302_v52 }
 0x664   :  { %v3035_v51 = vpop.eup %3034 }
 0x665   :  { %v1751_v19 = vadd.f32 1.0, %v3035_v51 }
 0x667   :  { %3036 = vrcp.f32 %v1751_v19 }
 0x668   :  { %3038 = vtanh.f32 %v1755_v9 }
 0x671   :  { %v3037_v28 = vpop.eup %3036 }
 0x672   :  { %v1759_v32 = vrot.slane %v3037_v28, 1  ;;  %v3039_v41 = vpop.eup %3038  ;;  %v1765_v14 = vrot.slane %v3037_v28, 2 }
 0x673   :  { %v1762_v45 = vmul.f32 %v3039_v41, %v3037_v28 }
 0x674   :  { %v1761_v47 = vmul.f32 %v1759_v32, %v3530_v44  ;;  %v2293_v44 = vld [vmem:[%s3673_s4 + $0x28] sm:$0xff] }
 0x675   :  { %v2970_v50 = vpack.c.bf16 %v2293_v44, %v2292_v43 }
 0x676   :  { %v3571_v8 = vadd.f32 %v1762_v45, %v1761_v47 }
 0x678   :  { %3040 = vtanh.f32 %v3571_v8 }
 0x682   :  { %v3041_v17 = vpop.eup %3040 }
 0x683   :  { %v1767_v23 = vmul.f32 %v3041_v17, %v1765_v14  ;;  %v2029_v17 = vld [vmem:[#allocation2 + $0x7] ss:$8 sm:$0xf] }
 0x685   :  { %1768 = vst [vmem:[#allocation3 + $0x5] sm:$0x1] %v1767_v23  ;;  %1900 = vmatmul.mubr.f32.vlgmr.msra.gmra.mrb[12].mxu0 %v1767_v23  ;;  %1971 = vmatmul.mubr.f32.vlgmr.msra.gmra.mrb[16].mxu1 %v1767_v23 }
 0x686   :  { %2902 = vmatpush1.bf16.msra.mxu0 %v3391_v13  ;;  %2934 = vmatpush1.bf16.msra.mxu1 %v3394_v18 }
 0x687   :  { %2904 = vmatprep.subr.bf16.mxu0 %v3399_v27  ;;  %2936 = vmatprep.subr.bf16.mxu1 %v3401_v39 }
 0x688   :  { %2158 = vmatprep.mubr.f32.mxu0 %v3085_v1  ;;  %2229 = vmatprep.mubr.f32.mxu1 %v3085_v1 }
 0x68a   :  { %2906 = vmatpush1.bf16.msra.mxu0 %v3403_v40  ;;  %2938 = vmatpush1.bf16.msra.mxu1 %v3406_v48 }
 0x68b   :  { %2908 = vmatprep.subr.bf16.mxu0 %v3411_v12  ;;  %2940 = vmatprep.subr.bf16.mxu1 %v3413_v62 }
 0x68e   :  { %2910 = vmatpush1.bf16.msra.mxu0 %v3415_v63  ;;  %2942 = vmatpush1.bf16.msra.mxu1 %v3418_v3 }
 0x68f   :  { %2912 = vmatprep.subr.bf16.mxu0 %v3423_v21  ;;  %2944 = vmatprep.subr.bf16.mxu1 %v3425_v34  ;;  %v1770_v21 = vld [vmem:[#allocation2 + $0x6] ss:$8 sm:$0xf] }
 0x692   :  { %2914 = vmatpush1.bf16.msra.mxu0 %v3427_v38  ;;  %2946 = vmatpush1.bf16.msra.mxu1 %v3430_v49 }
 0x693   :  { %2916 = vmatprep.subr.bf16.mxu0 %v3434_v61  ;;  %2948 = vmatprep.subr.bf16.mxu1 %v3437_v10 }
 0x696   :  { %2918 = vmatpush1.bf16.msra.mxu0 %v3439_v15  ;;  %2950 = vmatpush1.bf16.msra.mxu1 %v3442_v37 }
 0x697   :  { %2920 = vmatprep.subr.bf16.mxu0 %v3445_v53  ;;  %2952 = vmatprep.subr.bf16.mxu1 %v3447_v6 }
 0x69a   :  { %2922 = vmatpush1.bf16.msra.mxu0 %v3450_v22  ;;  %2954 = vmatpush1.bf16.msra.mxu1 %v3454_v35 }
 0x69b   :  { %2924 = vmatprep.subr.bf16.mxu0 %v3456_v36  ;;  %2956 = vmatprep.subr.bf16.mxu1 %v3459_v11 }
 0x69e   :  { %2926 = vmatpush1.bf16.msra.mxu0 %v3462_v5  ;;  %2958 = vmatpush1.bf16.msra.mxu1 %v3466_v20  ;;  %v2288_v20 = vld [vmem:[%s3673_s4] sm:$0xff] }
 0x69f   :  { %2928 = vmatprep.subr.bf16.mxu0 %v3468_v25  ;;  %2960 = vmatprep.subr.bf16.mxu1 %v3471_v42  ;;  %v2289_v25 = vld [vmem:[%s3673_s4 + $0x8] sm:$0xff] }
 0x6a0   :  { %v2964_v42 = vpack.c.bf16 %v2289_v25, %v2288_v20 }
 0x6a2   :  { %2930 = vmatpush1.bf16.msra.mxu0 %v3474_v55  ;;  %2962 = vmatpush1.bf16.msra.mxu1 %v3478_v58  ;;  %v3087_v55 = vmov 0.0|0.0   ;;  %v2290_v58 = vld [vmem:[%s3673_s4 + $0x10] sm:$0xff] }
 0x6a3   :  { %2963 = vmatprep.subr.bf16.mxu0 %v3087_v55  ;;  %v2967_v30 = vpack.c.bf16 %v2291_v26, %v2290_v58 }
 0x758   :  { %v1901_v13 = vpop.f32.mrb[12].mxu0  ;;  %v1972_v18 = vpop.f32.mrb[16].mxu1 }
 0x759   :  { %v1903_v27 = vpop.f32.mrb[13].mxu0  ;;  %v1974_v39 = vpop.f32.mrb[17].mxu1 }
 0x75a   :  { %v1981_v40 = vcombine.low %v1901_v13, %v1903_v27  ;;  %v1982_v48 = vcombine.low %v1972_v18, %v1974_v39 }
 0x75c   :  { %v1989_v12 = vrot.slane %v1981_v40, %v3297_v31  ;;  %v1996_v62 = vrot.slane %v1982_v48, %v3297_v31 }
 0x75e   :  { %v1997_v63 = vcombine.low %v1989_v12, %v1996_v62 }
 0x760   :  { %v2004_v3 = vrot.slane %v1997_v63, %v3297_v31 }
 0x762   :  { %v2006_v34 = vadd.f32 %v2004_v3, %v1770_v21 }
 0x764   :  { %v2396_v38 = vmul.f32 -1.442695, %v2006_v34  ;;  %v2014_v10 = vrot.slane %v2006_v34, 3 }
 0x766   :  { %3042 = vpow2.f32 %v2396_v38  ;;  %v2398_v38 = vld [vmem:[#allocation4] ss:$0 sm:$0xff] }
 0x770   :  { %v3043_v49 = vpop.eup %3042 }
 0x771   :  { %v2010_v61 = vadd.f32 1.0, %v3043_v49 }
 0x773   :  { %3044 = vrcp.f32 %v2010_v61 }
 0x774   :  { %3046 = vtanh.f32 %v2014_v10 }
 0x77d   :  { %v3045_v15 = vpop.eup %3044 }
 0x77e   :  { %v2018_v37 = vrot.slane %v3045_v15, 1  ;;  %v3047_v53 = vpop.eup %3046  ;;  %v2024_v36 = vrot.slane %v3045_v15, 2 }
 0x77f   :  { %v2021_v6 = vmul.f32 %v3047_v53, %v3045_v15 }
 0x780   :  { %v2020_v22 = vmul.f32 %v2018_v37, %v3571_v8 }
 0x782   :  { %v3610_v35 = vadd.f32 %v2021_v6, %v2020_v22 }
 0x784   :  { %3048 = vtanh.f32 %v3610_v35 }
 0x78e   :  { %v3049_v11 = vpop.eup %3048 }
 0x78f   :  { %v2026_v5 = vmul.f32 %v3049_v11, %v2024_v36 }
 0x791   :  { %2027 = vst [vmem:[#allocation3 + $0x6] sm:$0x1] %v2026_v5  ;;  %2159 = vmatmul.mubr.f32.vlgmr.msra.gmra.mrb[14].mxu0 %v2026_v5  ;;  %2230 = vmatmul.mubr.f32.vlgmr.msra.gmra.mrb[18].mxu1 %v2026_v5 }
 0x792   :  { %2965 = vmatpush3.bf16.msra.mxu0 %v2964_v42  ;;  %2448 = vmatprep.mubr.msk.f32.mxu0 %vm3088_vm1, %v3085_v1 }
 0x793   :  { %2966 = vmatprep.subr.bf16.mxu0 %v3087_v55 }
 0x796   :  { %2968 = vmatpush3.bf16.msra.mxu0 %v2967_v30 }
 0x797   :  { %2969 = vmatprep.subr.bf16.mxu0 %v3087_v55 }
 0x79a   :  { %2971 = vmatpush3.bf16.msra.mxu0 %v2970_v50 }
 0x79b   :  { %2972 = vmatprep.subr.bf16.mxu0 %v3087_v55 }
 0x79e   :  { %2974 = vmatpush3.bf16.msra.mxu0 %v2973_v59 }
 0x79f   :  { %2975 = vmatprep.subr.bf16.mxu0 %v3087_v55 }
 0x7a2   :  { %2977 = vmatpush3.bf16.msra.mxu0 %v2976_v2 }
 0x7a3   :  { %2978 = vmatprep.subr.bf16.mxu0 %v3087_v55 }
 0x7a6   :  { %2980 = vmatpush3.bf16.msra.mxu0 %v2979_v29 }
 0x7a7   :  { %2981 = vmatprep.subr.bf16.mxu0 %v3087_v55 }
 0x7aa   :  { %2983 = vmatpush3.bf16.msra.mxu0 %v2982_v0 }
 0x7ab   :  { %2984 = vmatprep.subr.bf16.mxu0 %v3087_v55 }
 0x7ae   :  { %2986 = vmatpush3.bf16.msra.mxu0 %v2985_v7 }
 0x864   :  { %v2160_v51 = vpop.f32.mrb[14].mxu0  ;;  %v2231_v19 = vpop.f32.mrb[18].mxu1 }
 0x865   :  { %v2162_v9 = vpop.f32.mrb[15].mxu0  ;;  %v2233_v28 = vpop.f32.mrb[19].mxu1 }
 0x866   :  { %v2240_v32 = vcombine.low %v2160_v51, %v2162_v9  ;;  %v2241_v41 = vcombine.low %v2231_v19, %v2233_v28 }
 0x868   :  { %v2248_v45 = vrot.slane %v2240_v32, %v3297_v31  ;;  %v2255_v47 = vrot.slane %v2241_v41, %v3297_v31 }
 0x86a   :  { %v2256_v8 = vcombine.low %v2248_v45, %v2255_v47 }
 0x86c   :  { %v2263_v14 = vrot.slane %v2256_v8, %v3297_v31 }
 0x86e   :  { %v2265_v23 = vadd.f32 %v2263_v14, %v2029_v17 }
 0x870   :  { %v2397_v1 = vmul.f32 -1.442695, %v2265_v23  ;;  %v2273_v27 = vrot.slane %v2265_v23, 3 }
 0x872   :  { %3050 = vpow2.f32 %v2397_v1 }
 0x87c   :  { %v3051_v13 = vpop.eup %3050 }
 0x87d   :  { %v2269_v18 = vadd.f32 1.0, %v3051_v13 }
 0x87f   :  { %3052 = vrcp.f32 %v2269_v18 }
 0x880   :  { %3054 = vtanh.f32 %v2273_v27 }
 0x889   :  { %v3053_v39 = vpop.eup %3052 }
 0x88a   :  { %v2277_v40 = vrot.slane %v3053_v39, 1  ;;  %v3055_v48 = vpop.eup %3054  ;;  %v2283_v3 = vrot.slane %v3053_v39, 2 }
 0x88b   :  { %v2280_v62 = vmul.f32 %v3055_v48, %v3053_v39 }
 0x88c   :  { %v2279_v12 = vmul.f32 %v2277_v40, %v3610_v35 }
 0x88e   :  { %v2281_v63 = vadd.f32 %v2280_v62, %v2279_v12 }
 0x890   :  { %3056 = vtanh.f32 %v2281_v63 }
 0x89a   :  { %v3057_v21 = vpop.eup %3056 }
 0x89b   :  { %v2285_v31 = vmul.f32 %v3057_v21, %v2283_v3 }
 0x89d   :  { %2286 = vst [vmem:[#allocation3 + $0x7] sm:$0x1] %v2285_v31 }
 0x8a4   :  { %v2287_v34 = vld [vmem:[#allocation3] sm:$0xff] }
 0x8a5   :  { %2449 = vmatmul.mubr.f32.vlgmr.msra.gmra.mrb[16].mxu0 %v2287_v34 }
 0x978   :  { %v2377_v49 = vpop.f32.mrb[16].mxu0 }
 0x979   :  { %v2378_v61 = vadd.f32 %v2398_v38, %v2377_v49  ;;  %v2450_v10 = vpop.f32.mrb[17].mxu0 }
 0x97b   :  { %2382 = vst.msk [vmem:[%s3675_s6] sm:$0xff] %vm2381_vm2, %v2378_v61 }
 0x97c   :  { %2387 = vsyncpa [#allocation6], 1 }

</bundles_post_ra>
